<compile_context>
chip_gen: v6e
topology: v6e:2x2x1
jax: 0.10.0
libtpu: 0.0.40
codegen_flags: <defaults>
</compile_context>

<pallas_src>
import jax
import jax.numpy as jnp
from jax.experimental import pallas as pl
from jax.experimental.pallas import tpu as pltpu


def fcnet_kernel(x_ref,
                 w1_ref, g1_ref, be1_ref,
                 w2_ref, g2_ref, be2_ref,
                 w3_ref, b3_ref,
                 out_ref):
    eps = jnp.float32(1e-5)

    x = x_ref[...]                                                    # (B, 784) bf16

    # ---- Linear(784 -> 256) [bias cancelled by BN mean subtraction]
    #      + BatchNorm1d(256) folded into one FMA + ReLU ----
    h1 = jnp.dot(x, w1_ref[...], preferred_element_type=jnp.float32)  # bf16 MXU, f32 acc
    mu1 = jnp.mean(h1, axis=0, keepdims=True)                         # (1, 256)
    var1 = jnp.mean(h1 * h1, axis=0, keepdims=True) - mu1 * mu1       # one-sweep biased var
    scale1 = g1_ref[...] * jax.lax.rsqrt(var1 + eps)                  # (1, 256)
    shift1 = be1_ref[...] - mu1 * scale1
    a1 = jnp.maximum(h1 * scale1 + shift1, 0.0)                       # (B, 256) f32

    # ---- Linear(256 -> 512) [bias dropped] + BatchNorm1d(512) + ReLU ----
    # Activations stay f32 for accuracy; weights arrive bf16 (cheap DMA) and are
    # widened in VMEM for a full-precision accumulate.  At B=8 the extra MXU
    # passes for f32 operands are irrelevant (the kernel is DMA-bound).
    h2 = jnp.dot(a1, w2_ref[...].astype(jnp.float32),
                 preferred_element_type=jnp.float32)                  # (B, 512) f32
    mu2 = jnp.mean(h2, axis=0, keepdims=True)
    var2 = jnp.mean(h2 * h2, axis=0, keepdims=True) - mu2 * mu2
    scale2 = g2_ref[...] * jax.lax.rsqrt(var2 + eps)
    shift2 = be2_ref[...] - mu2 * scale2
    a2 = jnp.maximum(h2 * scale2 + shift2, 0.0)                       # (B, 512) f32

    # ---- Linear(512 -> 10) + log_softmax(dim=1) ----
    logits = jnp.dot(a2, w3_ref[...].astype(jnp.float32),
                     preferred_element_type=jnp.float32) + b3_ref[...]
    m = jnp.max(logits, axis=-1, keepdims=True)
    lse = jnp.log(jnp.sum(jnp.exp(logits - m), axis=-1, keepdims=True)) + m
    # (B, 10) output is lane-sparse (masked vst); negligible at this size.
    out_ref[...] = (logits - lse).astype(out_ref.dtype)


def fcnet_forward(x, params):
    B = x.shape[0]
    x_flat = x.reshape(B, 28 * 28).astype(jnp.bfloat16)               # glue: flatten NCHW, bf16 feed

    (w1, b1, g1, be1, w2, b2, g2, be2, w3, b3) = params
    del b1, b2  # cancelled exactly by training-mode BatchNorm mean subtraction

    args = (x_flat,
            w1.astype(jnp.bfloat16), g1, be1,
            w2.astype(jnp.bfloat16), g2, be2,
            w3.astype(jnp.bfloat16), b3)

    vmem = pl.BlockSpec(memory_space=pltpu.MemorySpace.VMEM)
    return pl.pallas_call(
        fcnet_kernel,
        out_shape=jax.ShapeDtypeStruct((B, 10), jnp.float32),
        in_specs=[vmem] * len(args),
        out_specs=vmem,
        compiler_params=pltpu.CompilerParams(
            vmem_limit_bytes=32 * 1024 * 1024),                       # explicit; safe on v5e/v6e/v7x
    )(*args)


def init_params(key):
    """Deterministic parameter init mimicking PyTorch defaults.

    Linear: U(-1/sqrt(fan_in), 1/sqrt(fan_in)) for W and b.
    BatchNorm1d: weight=1, bias=0.
    Weights are stored as (in, out), i.e. already transposed vs torch.
    b1/b2 are still created (module fidelity / reference) but the kernel does
    not consume them.
    """
    def linear(key, fan_in, fan_out):
        kw, kb = jax.random.split(key)
        bound = 1.0 / jnp.sqrt(jnp.float32(fan_in))
        w = jax.random.uniform(kw, (fan_in, fan_out), jnp.float32, -bound, bound)
        b = jax.random.uniform(kb, (1, fan_out), jnp.float32, -bound, bound)
        return w, b

    k1, k2, k3 = jax.random.split(key, 3)
    w1, b1 = linear(k1, 28 * 28, 256)
    w2, b2 = linear(k2, 256, 512)
    w3, b3 = linear(k3, 512, 10)
    g1, be1 = jnp.ones((1, 256), jnp.float32), jnp.zeros((1, 256), jnp.float32)
    g2, be2 = jnp.ones((1, 512), jnp.float32), jnp.zeros((1, 512), jnp.float32)
    return (w1, b1, g1, be1, w2, b2, g2, be2, w3, b3)


def fcnet_reference(x, params):
    """Pure-JAX reference with the original module semantics (biases included,
    two-pass variance).  x/weights are rounded to bf16 so the shared weight
    quantization is not part of the error budget; all math stays f32."""
    (w1, b1, g1, be1, w2, b2, g2, be2, w3, b3) = params
    eps = 1e-5
    hp = jax.lax.Precision.HIGHEST
    q = lambda a: a.astype(jnp.bfloat16).astype(jnp.float32)

    h = q(x.reshape(x.shape[0], -1))
    h = jnp.dot(h, q(w1), precision=hp) + b1
    h = (h - h.mean(0, keepdims=True)) / jnp.sqrt(h.var(0, keepdims=True) + eps) * g1 + be1
    h = jnp.maximum(h, 0.0)

    h = jnp.dot(h, q(w2), precision=hp) + b2
    h = (h - h.mean(0, keepdims=True)) / jnp.sqrt(h.var(0, keepdims=True) + eps) * g2 + be2
    h = jnp.maximum(h, 0.0)

    logits = jnp.dot(h, q(w3), precision=hp) + b3
    return jax.nn.log_softmax(logits, axis=1)


if __name__ == "__main__":
    key = jax.random.PRNGKey(0)
    kx, kp = jax.random.split(key)

    B = 8
    x = jax.random.normal(kx, (B, 1, 28, 28), dtype=jnp.float32)      # NCHW like PyTorch
    params = init_params(kp)

    out = fcnet_forward(x, params)
    out = jax.block_until_ready(out)

    ref = fcnet_reference(x, params)
    assert out.shape == (B, 10)
    # bf16 weight/input feed -> tolerance loosened vs a pure-f32 check.
    assert jnp.allclose(out, ref, atol=2e-2, rtol=2e-2), "mismatch vs JAX reference"

    print("KERNEL_OK")
</pallas_src>

<mosaic_0001>
module attributes {stable_mosaic.version = 11 : i64} {
  func.func @fcnet_kernel(%arg0: memref<8x784xbf16, #tpu.memory_space<vmem>>, %arg1: memref<784x256xbf16, #tpu.memory_space<vmem>>, %arg2: memref<1x256xf32, #tpu.memory_space<vmem>>, %arg3: memref<1x256xf32, #tpu.memory_space<vmem>>, %arg4: memref<256x512xbf16, #tpu.memory_space<vmem>>, %arg5: memref<1x512xf32, #tpu.memory_space<vmem>>, %arg6: memref<1x512xf32, #tpu.memory_space<vmem>>, %arg7: memref<512x10xbf16, #tpu.memory_space<vmem>>, %arg8: memref<1x10xf32, #tpu.memory_space<vmem>>, %arg9: memref<8x10xf32, #tpu.memory_space<vmem>>) attributes {dimension_semantics = [], scalar_prefetch = 0 : i64, scratch_operands = 0 : i64, tpu.core_type = #tpu.core_type<tc>} {
    %c0 = arith.constant 0 : index
    %c0_0 = arith.constant 0 : index
    %0 = vector.load %arg0[%c0, %c0_0] : memref<8x784xbf16, #tpu.memory_space<vmem>>, vector<8x784xbf16>
    %c0_1 = arith.constant 0 : index
    %c0_2 = arith.constant 0 : index
    %1 = vector.load %arg1[%c0_1, %c0_2] : memref<784x256xbf16, #tpu.memory_space<vmem>>, vector<784x256xbf16>
    %cst = arith.constant dense<0.000000e+00> : vector<8x256xf32>
    %2 = tpu.matmul %0, %1, %cst {dimension_numbers = #tpu.dot_dimension_numbers<[1], [0], [0], [1], [0, 0, 1, 1], [], []>} : vector<8x784xbf16>, vector<784x256xbf16>, vector<8x256xf32> -> vector<8x256xf32>
    %cst_3 = arith.constant dense<0.000000e+00> : vector<256xf32>
    %3 = vector.multi_reduction <add>, %2, %cst_3 [0] : vector<8x256xf32> to vector<256xf32>
    %4 = vector.shape_cast %3 : vector<256xf32> to vector<1x256xf32>
    %cst_4 = arith.constant 8.000000e+00 : f32
    %5 = vector.broadcast %cst_4 : f32 to vector<1x256xf32>
    %6 = arith.divf %4, %5 : vector<1x256xf32>
    %7 = arith.mulf %2, %2 : vector<8x256xf32>
    %cst_5 = arith.constant dense<0.000000e+00> : vector<256xf32>
    %8 = vector.multi_reduction <add>, %7, %cst_5 [0] : vector<8x256xf32> to vector<256xf32>
    %9 = vector.shape_cast %8 : vector<256xf32> to vector<1x256xf32>
    %cst_6 = arith.constant 8.000000e+00 : f32
    %10 = vector.broadcast %cst_6 : f32 to vector<1x256xf32>
    %11 = arith.divf %9, %10 : vector<1x256xf32>
    %12 = arith.mulf %6, %6 : vector<1x256xf32>
    %13 = arith.subf %11, %12 : vector<1x256xf32>
    %c0_7 = arith.constant 0 : index
    %c0_8 = arith.constant 0 : index
    %14 = vector.load %arg2[%c0_7, %c0_8] : memref<1x256xf32, #tpu.memory_space<vmem>>, vector<1x256xf32>
    %cst_9 = arith.constant 9.99999974E-6 : f32
    %15 = vector.broadcast %cst_9 : f32 to vector<1x256xf32>
    %16 = arith.addf %13, %15 : vector<1x256xf32>
    %17 = math.rsqrt %16 : vector<1x256xf32>
    %18 = arith.mulf %14, %17 : vector<1x256xf32>
    %c0_10 = arith.constant 0 : index
    %c0_11 = arith.constant 0 : index
    %19 = vector.load %arg3[%c0_10, %c0_11] : memref<1x256xf32, #tpu.memory_space<vmem>>, vector<1x256xf32>
    %20 = arith.mulf %6, %18 : vector<1x256xf32>
    %21 = arith.subf %19, %20 : vector<1x256xf32>
    %22 = vector.broadcast %18 : vector<1x256xf32> to vector<8x256xf32>
    %23 = arith.mulf %2, %22 : vector<8x256xf32>
    %24 = vector.broadcast %21 : vector<1x256xf32> to vector<8x256xf32>
    %25 = arith.addf %23, %24 : vector<8x256xf32>
    %cst_12 = arith.constant 0.000000e+00 : f32
    %26 = vector.broadcast %cst_12 : f32 to vector<8x256xf32>
    %27 = arith.maximumf %25, %26 : vector<8x256xf32>
    %c0_13 = arith.constant 0 : index
    %c0_14 = arith.constant 0 : index
    %28 = vector.load %arg4[%c0_13, %c0_14] : memref<256x512xbf16, #tpu.memory_space<vmem>>, vector<256x512xbf16>
    %29 = arith.extf %28 : vector<256x512xbf16> to vector<256x512xf32>
    %cst_15 = arith.constant dense<0.000000e+00> : vector<8x512xf32>
    %30 = tpu.matmul %27, %29, %cst_15 {dimension_numbers = #tpu.dot_dimension_numbers<[1], [0], [0], [1], [0, 0, 1, 1], [], []>} : vector<8x256xf32>, vector<256x512xf32>, vector<8x512xf32> -> vector<8x512xf32>
    %cst_16 = arith.constant dense<0.000000e+00> : vector<512xf32>
    %31 = vector.multi_reduction <add>, %30, %cst_16 [0] : vector<8x512xf32> to vector<512xf32>
    %32 = vector.shape_cast %31 : vector<512xf32> to vector<1x512xf32>
    %cst_17 = arith.constant 8.000000e+00 : f32
    %33 = vector.broadcast %cst_17 : f32 to vector<1x512xf32>
    %34 = arith.divf %32, %33 : vector<1x512xf32>
    %35 = arith.mulf %30, %30 : vector<8x512xf32>
    %cst_18 = arith.constant dense<0.000000e+00> : vector<512xf32>
    %36 = vector.multi_reduction <add>, %35, %cst_18 [0] : vector<8x512xf32> to vector<512xf32>
    %37 = vector.shape_cast %36 : vector<512xf32> to vector<1x512xf32>
    %cst_19 = arith.constant 8.000000e+00 : f32
    %38 = vector.broadcast %cst_19 : f32 to vector<1x512xf32>
    %39 = arith.divf %37, %38 : vector<1x512xf32>
    %40 = arith.mulf %34, %34 : vector<1x512xf32>
    %41 = arith.subf %39, %40 : vector<1x512xf32>
    %c0_20 = arith.constant 0 : index
    %c0_21 = arith.constant 0 : index
    %42 = vector.load %arg5[%c0_20, %c0_21] : memref<1x512xf32, #tpu.memory_space<vmem>>, vector<1x512xf32>
    %cst_22 = arith.constant 9.99999974E-6 : f32
    %43 = vector.broadcast %cst_22 : f32 to vector<1x512xf32>
    %44 = arith.addf %41, %43 : vector<1x512xf32>
    %45 = math.rsqrt %44 : vector<1x512xf32>
    %46 = arith.mulf %42, %45 : vector<1x512xf32>
    %c0_23 = arith.constant 0 : index
    %c0_24 = arith.constant 0 : index
    %47 = vector.load %arg6[%c0_23, %c0_24] : memref<1x512xf32, #tpu.memory_space<vmem>>, vector<1x512xf32>
    %48 = arith.mulf %34, %46 : vector<1x512xf32>
    %49 = arith.subf %47, %48 : vector<1x512xf32>
    %50 = vector.broadcast %46 : vector<1x512xf32> to vector<8x512xf32>
    %51 = arith.mulf %30, %50 : vector<8x512xf32>
    %52 = vector.broadcast %49 : vector<1x512xf32> to vector<8x512xf32>
    %53 = arith.addf %51, %52 : vector<8x512xf32>
    %cst_25 = arith.constant 0.000000e+00 : f32
    %54 = vector.broadcast %cst_25 : f32 to vector<8x512xf32>
    %55 = arith.maximumf %53, %54 : vector<8x512xf32>
    %c0_26 = arith.constant 0 : index
    %c0_27 = arith.constant 0 : index
    %56 = vector.load %arg7[%c0_26, %c0_27] : memref<512x10xbf16, #tpu.memory_space<vmem>>, vector<512x10xbf16>
    %57 = arith.extf %56 : vector<512x10xbf16> to vector<512x10xf32>
    %cst_28 = arith.constant dense<0.000000e+00> : vector<8x10xf32>
    %58 = tpu.matmul %55, %57, %cst_28 {dimension_numbers = #tpu.dot_dimension_numbers<[1], [0], [0], [1], [0, 0, 1, 1], [], []>} : vector<8x512xf32>, vector<512x10xf32>, vector<8x10xf32> -> vector<8x10xf32>
    %c0_29 = arith.constant 0 : index
    %c0_30 = arith.constant 0 : index
    %59 = vector.load %arg8[%c0_29, %c0_30] : memref<1x10xf32, #tpu.memory_space<vmem>>, vector<1x10xf32>
    %60 = vector.broadcast %59 : vector<1x10xf32> to vector<8x10xf32>
    %61 = arith.addf %58, %60 : vector<8x10xf32>
    %cst_31 = arith.constant dense<0xFF800000> : vector<8xf32>
    %62 = vector.multi_reduction <maximumf>, %61, %cst_31 [1] : vector<8x10xf32> to vector<8xf32>
    %63 = vector.shape_cast %62 : vector<8xf32> to vector<8x1xf32>
    %64 = vector.broadcast %63 : vector<8x1xf32> to vector<8x10xf32>
    %65 = arith.subf %61, %64 : vector<8x10xf32>
    %66 = math.exp %65 : vector<8x10xf32>
    %cst_32 = arith.constant dense<0.000000e+00> : vector<8xf32>
    %67 = vector.multi_reduction <add>, %66, %cst_32 [1] : vector<8x10xf32> to vector<8xf32>
    %68 = vector.shape_cast %67 : vector<8xf32> to vector<8x1xf32>
    %69 = math.log %68 : vector<8x1xf32>
    %70 = arith.addf %69, %63 : vector<8x1xf32>
    %71 = vector.broadcast %70 : vector<8x1xf32> to vector<8x10xf32>
    %72 = arith.subf %61, %71 : vector<8x10xf32>
    %c0_33 = arith.constant 0 : index
    %c0_34 = arith.constant 0 : index
    %73 = vector.load %arg9[%c0_33, %c0_34] : memref<8x10xf32, #tpu.memory_space<vmem>>, vector<8x10xf32>
    tpu.vector_store %arg9[%c0_33, %c0_34], %72 {strides = array<i32>} : memref<8x10xf32, #tpu.memory_space<vmem>>, vector<8x10xf32>,
    return
  }
}

</mosaic_0001>

<bundles_post_ra>
// kernel: tpu_custom_call.1
= control target key start
LH: loop header
LB: loop body
LE: loop exit
PB: predicated region body
PF: predicated region fallthrough
CT: control target
= control target key end

     0   :  { %14 = vsyncpa [#allocation3], 0  ;;  %s2656_s0 = inlined_call_operand.vmem [shape: bf16[8,784], index: 0, kind: input, shape index: {}]   ;;  %s2657_s1 = inlined_call_operand.hbm [shape: bf16[784,256], index: 1, kind: input, shape index: {}]   ;;  %s2658_s2 = inlined_call_operand.vmem [shape: f32[1,256], index: 2, kind: input, shape index: {}]   ;;  %s2659_s3 = inlined_call_operand.vmem [shape: f32[1,256], index: 3, kind: input, shape index: {}]   ;;  %s2660_s4 = inlined_call_operand.hbm [shape: bf16[256,512], index: 4, kind: input, shape index: {}]   ;;  %s2661_s5 = inlined_call_operand.vmem [shape: f32[1,512], index: 5, kind: input, shape index: {}]   ;;  %s2662_s6 = inlined_call_operand.vmem [shape: f32[1,512], index: 6, kind: input, shape index: {}]   ;;  %s2663_s7 = inlined_call_operand.vmem [shape: bf16[512,10], index: 7, kind: input, shape index: {}]   ;;  %s2664_s8 = inlined_call_operand.vmem [shape: f32[1,10], index: 8, kind: input, shape index: {}]   ;;  %s2665_s9 = inlined_call_operand.hbm [shape: f32[8,10], index: 9, kind: output, shape index: {}]  }
   0x1   :  { %15 = vsyncpa [#allocation6], 0 }
   0x2   :  { %16 = vsyncpa [#allocation4], 0  ;;  %s2372_s30 = smov [#allocation2]  }
   0x3   :  { %s24_s10 = sshll.u32 %s2372_s30, 4  ;;  %s25_s10 = int_to_ptr.vmem [resolvable:$true] %s24_s10 }
   0x4   :  { %s2314_s11 = scalar_lea.vmem %s25_s10, 12544  ;;  %p2319_p1 = scmp.lt.s32.totalorder %s25_s10, %s25_s10 }
   0x5   :  { %p2315_p0 = scmp.ne.s32.totalorder %s25_s10, %s2314_s11  ;;  %p2320_p2 = scmp.lt.s32.totalorder %s2314_s11, %s2314_s11 }
   0x7   :  { %p2321_p3 = por %p2320_p2, %p2319_p1 }
   0x9   :  { %p2322_p4 = pnand %p2321_p3, %p2315_p0 }
   0xb   :  { %2325 = shalt.err (!%p2322_p4)
}
   0xc   :  { %s2373_s12 = smov 128   ;;  %s2374_s13 = smov 8  }
   0xd   :  { %30 = dma.hbm_to_vmem [thread:$0]  %s2657_s1, 12544, %s25_s10, [#allocation3], %s2373_s12, %s2373_s12, %s2374_s13  }
   0xe   :  { %s2375_s16 = smov [#allocation5]  }
   0xf   :  { %s40_s17 = sshll.u32 %s2375_s16, 4  ;;  %s41_s17 = int_to_ptr.vmem [resolvable:$true] %s40_s17 }
  0x10   :  { %s2334_s18 = scalar_lea.vmem %s41_s17, 8192  ;;  %p2339_p6 = scmp.lt.s32.totalorder %s41_s17, %s41_s17 }
  0x11   :  { %p2335_p5 = scmp.ne.s32.totalorder %s41_s17, %s2334_s18  ;;  %p2340_p7 = scmp.lt.s32.totalorder %s2334_s18, %s2334_s18 }
  0x13   :  { %p2341_p8 = por %p2340_p7, %p2339_p6 }
  0x15   :  { %p2342_p9 = pnand %p2341_p8, %p2335_p5 }
  0x17   :  { %2345 = shalt.err (!%p2342_p9)
}
  0x18   :  { %s2376_s19 = smov 256   ;;  %s2377_s20 = smov 16  }
  0x19   :  { %46 = dma.hbm_to_vmem [thread:$0]  %s2660_s4, 8192, %s41_s17, [#allocation6], %s2376_s19, %s2376_s19, %s2377_s20  }
  0x1a   :  { %2366 = dma.done.wait [#allocation3], 12544  }
  0x1b   :  { %2367 = vsyncadd [#allocation3], 4294954752 }
  0x1c   :  { %2368 = dma.done.wait [#allocation6], 8192  }
  0x1d   :  { %2369 = vsyncadd [#allocation6], 4294959104  ;;  %v2136_v0 = vld [vmem:[#allocation2 + $0x74] ss:$8 sps:$4 sm:$0xff]   ;;  %v2140_v2 = vld [vmem:[#allocation2 + $0x70] ss:$8 sps:$4 sm:$0xff]  }
  0x1e   :  { %v2138_v1 = vld [vmem:[#allocation2 + $0x174] ss:$8 sps:$4 sm:$0xff]   ;;  %682 = vmatprep.subr.bf16.mxu0 %v2136_v0  ;;  %v2141_v3 = vld [vmem:[#allocation2 + $0x170] ss:$8 sps:$4 sm:$0xff]   ;;  %v2142_v4 = vld [vmem:[#allocation2 + $0x64] ss:$8 sps:$4 sm:$0xff]  }
  0x1f   :  { %723 = vmatprep.subr.bf16.mxu1 %v2138_v1  ;;  %683 = vmatpush1.bf16.msra.mxu0 %v2140_v2  ;;  %v2144_v5 = vld [vmem:[#allocation2 + $0x164] ss:$8 sps:$4 sm:$0xff]   ;;  %v2146_v6 = vld [vmem:[#allocation2 + $0x60] ss:$8 sps:$4 sm:$0xff]   ;;  %v2148_v8 = vld [vmem:[#allocation2 + $0x54] ss:$8 sps:$4 sm:$0xff]  }
  0x20   :  { %724 = vmatpush1.bf16.msra.mxu1 %v2141_v3  ;;  %684 = vmatprep.subr.bf16.mxu0 %v2142_v4  ;;  %v2147_v7 = vld [vmem:[#allocation2 + $0x160] ss:$8 sps:$4 sm:$0xff]   ;;  %v2150_v9 = vld [vmem:[#allocation2 + $0x154] ss:$8 sps:$4 sm:$0xff]   ;;  %v2152_v10 = vld [vmem:[#allocation2 + $0x50] ss:$8 sps:$4 sm:$0xff]  }
  0x21   :  { %725 = vmatprep.subr.bf16.mxu1 %v2144_v5  ;;  %v2153_v11 = vld [vmem:[#allocation2 + $0x150] ss:$8 sps:$4 sm:$0xff]   ;;  %v2154_v12 = vld [vmem:[#allocation2 + $0x44] ss:$8 sps:$4 sm:$0xff]   ;;  %v2158_v14 = vld [vmem:[#allocation2 + $0x40] ss:$8 sps:$4 sm:$0xff]  }
  0x22   :  { %v2156_v13 = vld [vmem:[#allocation2 + $0x144] ss:$8 sps:$4 sm:$0xff]   ;;  %v2159_v15 = vld [vmem:[#allocation2 + $0x140] ss:$8 sps:$4 sm:$0xff]   ;;  %v2160_v16 = vld [vmem:[#allocation2 + $0x34] ss:$8 sps:$4 sm:$0xff]  }
  0x23   :  { %685 = vmatpush1.bf16.msra.mxu0 %v2146_v6  ;;  %v2162_v17 = vld [vmem:[#allocation2 + $0x134] ss:$8 sps:$4 sm:$0xff]   ;;  %v2164_v18 = vld [vmem:[#allocation2 + $0x30] ss:$8 sps:$4 sm:$0xff]   ;;  %v2166_v20 = vld [vmem:[#allocation2 + $0x24] ss:$8 sps:$4 sm:$0xff]  }
  0x24   :  { %726 = vmatpush1.bf16.msra.mxu1 %v2147_v7  ;;  %686 = vmatprep.subr.bf16.mxu0 %v2148_v8  ;;  %v2165_v19 = vld [vmem:[#allocation2 + $0x130] ss:$8 sps:$4 sm:$0xff]   ;;  %v2168_v21 = vld [vmem:[#allocation2 + $0x124] ss:$8 sps:$4 sm:$0xff]   ;;  %v2170_v22 = vld [vmem:[#allocation2 + $0x20] ss:$8 sps:$4 sm:$0xff]  }
  0x25   :  { %727 = vmatprep.subr.bf16.mxu1 %v2150_v9  ;;  %v2171_v23 = vld [vmem:[#allocation2 + $0x120] ss:$8 sps:$4 sm:$0xff]   ;;  %v2172_v24 = vld [vmem:[#allocation2 + $0x14] ss:$8 sps:$4 sm:$0xff]   ;;  %v2176_v26 = vld [vmem:[#allocation2 + $0x10] ss:$8 sps:$4 sm:$0xff]  }
  0x26   :  { %v2174_v25 = vld [vmem:[#allocation2 + $0x114] ss:$8 sps:$4 sm:$0xff]   ;;  %v2177_v27 = vld [vmem:[#allocation2 + $0x110] ss:$8 sps:$4 sm:$0xff]   ;;  %v2178_v28 = vld [vmem:[#allocation2 + $0x4] ss:$8 sps:$4 sm:$0xff]  }
  0x27   :  { %687 = vmatpush1.bf16.msra.mxu0 %v2152_v10  ;;  %v2180_v29 = vld [vmem:[#allocation2 + $0x104] ss:$8 sps:$4 sm:$0xff]   ;;  %v2182_v30 = vld [vmem:[#allocation2] ss:$8 sps:$4 sm:$0xff]   ;;  %v2184_v32 = vld [vmem:[#allocation2 + $0xf4] ss:$8 sps:$4 sm:$0xff]  }
  0x28   :  { %728 = vmatpush1.bf16.msra.mxu1 %v2153_v11  ;;  %688 = vmatprep.subr.bf16.mxu0 %v2154_v12  ;;  %v2183_v31 = vld [vmem:[#allocation2 + $0x100] ss:$8 sps:$4 sm:$0xff]   ;;  %v2186_v33 = vld [vmem:[#allocation2 + $0x1f4] ss:$8 sps:$4 sm:$0xff]   ;;  %v2188_v34 = vld [vmem:[#allocation2 + $0xf0] ss:$8 sps:$4 sm:$0xff]  }
  0x29   :  { %729 = vmatprep.subr.bf16.mxu1 %v2156_v13  ;;  %v2189_v35 = vld [vmem:[#allocation2 + $0x1f0] ss:$8 sps:$4 sm:$0xff]   ;;  %v2190_v36 = vld [vmem:[#allocation2 + $0xe4] ss:$8 sps:$4 sm:$0xff]   ;;  %v2194_v38 = vld [vmem:[#allocation2 + $0xe0] ss:$8 sps:$4 sm:$0xff]  }
  0x2a   :  { %v2192_v37 = vld [vmem:[#allocation2 + $0x1e4] ss:$8 sps:$4 sm:$0xff]   ;;  %v2195_v39 = vld [vmem:[#allocation2 + $0x1e0] ss:$8 sps:$4 sm:$0xff]   ;;  %v2196_v40 = vld [vmem:[#allocation2 + $0xd4] ss:$8 sps:$4 sm:$0xff]  }
  0x2b   :  { %689 = vmatpush1.bf16.msra.mxu0 %v2158_v14  ;;  %v2198_v41 = vld [vmem:[#allocation2 + $0x1d4] ss:$8 sps:$4 sm:$0xff]   ;;  %v2200_v42 = vld [vmem:[#allocation2 + $0xd0] ss:$8 sps:$4 sm:$0xff]   ;;  %v2202_v44 = vld [vmem:[#allocation2 + $0xc4] ss:$8 sps:$4 sm:$0xff]  }
  0x2c   :  { %730 = vmatpush1.bf16.msra.mxu1 %v2159_v15  ;;  %690 = vmatprep.subr.bf16.mxu0 %v2160_v16  ;;  %v2201_v43 = vld [vmem:[#allocation2 + $0x1d0] ss:$8 sps:$4 sm:$0xff]   ;;  %v2204_v45 = vld [vmem:[#allocation2 + $0x1c4] ss:$8 sps:$4 sm:$0xff]   ;;  %v2206_v49 = vld [vmem:[#allocation2 + $0xc0] ss:$8 sps:$4 sm:$0xff]  }
  0x2d   :  { %731 = vmatprep.subr.bf16.mxu1 %v2162_v17  ;;  %v62_v46 = vld [vmem:[%s2656_s0] sm:$0xff]  ;;  %v63_v48 = vld [vmem:[%s2656_s0 + $0x8] sm:$0xff]  ;;  %v2208_v52 = vld [vmem:[#allocation2 + $0xb4] ss:$8 sps:$4 sm:$0xff]   ;;  %v2378_v15 = vmov 0   ;;  %vm678_vm0 = vcmask 130048  }
  0x2e   :  { %v1792_v47 = vcombine.high %v62_v46, %v62_v46  ;;  %v2207_v50 = vld [vmem:[#allocation2 + $0x1c0] ss:$8 sps:$4 sm:$0xff]   ;;  %v1794_v51 = vcombine.high %v63_v48, %v63_v48  ;;  %v2210_v53 = vld [vmem:[#allocation2 + $0x1b4] ss:$8 sps:$4 sm:$0xff]   ;;  %v2212_v54 = vld [vmem:[#allocation2 + $0xb0] ss:$8 sps:$4 sm:$0xff]   ;;  %v1791_v5 = vcombine.low %v62_v46, %v62_v46  ;;  %v1793_v6 = vcombine.low %v63_v48, %v63_v48 }
  0x2f   :  { %691 = vmatpush1.bf16.msra.mxu0 %v2164_v18  ;;  %v2213_v55 = vld [vmem:[#allocation2 + $0x1b0] ss:$8 sps:$4 sm:$0xff]   ;;  %v2214_v56 = vld [vmem:[#allocation2 + $0xa4] ss:$8 sps:$4 sm:$0xff]   ;;  %v2218_v58 = vld [vmem:[#allocation2 + $0xa0] ss:$8 sps:$4 sm:$0xff]  }
  0x30   :  { %732 = vmatpush1.bf16.msra.mxu1 %v2165_v19  ;;  %692 = vmatprep.subr.bf16.mxu0 %v2166_v20  ;;  %v2216_v57 = vld [vmem:[#allocation2 + $0x1a4] ss:$8 sps:$4 sm:$0xff]   ;;  %v2219_v59 = vld [vmem:[#allocation2 + $0x1a0] ss:$8 sps:$4 sm:$0xff]   ;;  %v2220_v60 = vld [vmem:[#allocation2 + $0x94] ss:$8 sps:$4 sm:$0xff]  }
  0x31   :  { %733 = vmatprep.subr.bf16.mxu1 %v2168_v21  ;;  %714 = vmatprep.mubr.bf16.mxu0 %v1792_v47  ;;  %v2222_v61 = vld [vmem:[#allocation2 + $0x194] ss:$8 sps:$4 sm:$0xff]   ;;  %v2224_v62 = vld [vmem:[#allocation2 + $0x90] ss:$8 sps:$4 sm:$0xff]   ;;  %v2226_v0 = vld [vmem:[#allocation2 + $0x84] ss:$8 sps:$4 sm:$0xff]  }
  0x32   :  { %755 = vmatprep.mubr.bf16.mxu1 %v1794_v51  ;;  %v2225_v63 = vld [vmem:[#allocation2 + $0x190] ss:$8 sps:$4 sm:$0xff]   ;;  %v2228_v1 = vld [vmem:[#allocation2 + $0x184] ss:$8 sps:$4 sm:$0xff]   ;;  %v2230_v2 = vld [vmem:[#allocation2 + $0x80] ss:$8 sps:$4 sm:$0xff]  }
  0x33   :  { %693 = vmatpush1.bf16.msra.mxu0 %v2170_v22  ;;  %v2231_v3 = vld [vmem:[#allocation2 + $0x180] ss:$8 sps:$4 sm:$0xff]   ;;  %v2238_v4 = vld [vmem:[#allocation2 + $0x274] ss:$8 sps:$4 sm:$0xff]   ;;  %v2236_v7 = vld [vmem:[#allocation2 + $0x270] ss:$8 sps:$4 sm:$0xff]  }
  0x34   :  { %734 = vmatpush1.bf16.msra.mxu1 %v2171_v23  ;;  %694 = vmatprep.subr.bf16.mxu0 %v2172_v24  ;;  %v2281_v8 = vld [vmem:[#allocation2 + $0x300] ss:$8 sps:$4 sm:$0xff]   ;;  %v2283_v9 = vld [vmem:[#allocation2 + $0x304] ss:$8 sps:$4 sm:$0xff]   ;;  %v2446_v11 = vld [vmem:[%s2656_s0 + $0x10] sm:$0xff]  ;;  %vm1760_vm1 = vcmask 80896  }
  0x35   :  { %735 = vmatprep.subr.bf16.mxu1 %v2174_v25  ;;  %v2241_v10 = vld [vmem:[#allocation2 + $0x264] ss:$8 sps:$4 sm:$0xff]   ;;  %v1796_v12 = vcombine.high %v2446_v11, %v2446_v11  ;;  %v2239_v13 = vld [vmem:[#allocation2 + $0x260] ss:$8 sps:$4 sm:$0xff]   ;;  %v2244_v14 = vld [vmem:[#allocation2 + $0x254] ss:$8 sps:$4 sm:$0xff]  }
  0x36   :  { %v2287_v16 = vld [vmem:[%s2656_s0 + $0x18] ss:$0 sps:$4 sm:$0xff]   ;;  %v2247_v18 = vld [vmem:[#allocation2 + $0x244] ss:$8 sps:$4 sm:$0xff]   ;;  %v2245_v19 = vld [vmem:[#allocation2 + $0x240] ss:$8 sps:$4 sm:$0xff]  }
  0x37   :  { %695 = vmatpush1.bf16.msra.mxu0 %v2176_v26  ;;  %v2242_v17 = vld [vmem:[#allocation2 + $0x250] ss:$8 sps:$4 sm:$0xff]   ;;  %v2250_v20 = vld [vmem:[#allocation2 + $0x234] ss:$8 sps:$4 sm:$0xff]   ;;  %v2253_v22 = vld [vmem:[#allocation2 + $0x224] ss:$8 sps:$4 sm:$0xff]  }
  0x38   :  { %736 = vmatpush1.bf16.msra.mxu1 %v2177_v27  ;;  %696 = vmatprep.subr.bf16.mxu0 %v2178_v28  ;;  %v2248_v21 = vld [vmem:[#allocation2 + $0x230] ss:$8 sps:$4 sm:$0xff]   ;;  %v2251_v23 = vld [vmem:[#allocation2 + $0x220] ss:$8 sps:$4 sm:$0xff]   ;;  %v2256_v24 = vld [vmem:[#allocation2 + $0x214] ss:$8 sps:$4 sm:$0xff]  }
  0x39   :  { %737 = vmatprep.subr.bf16.mxu1 %v2180_v29  ;;  %v2254_v25 = vld [vmem:[#allocation2 + $0x210] ss:$8 sps:$4 sm:$0xff]   ;;  %v2259_v26 = vld [vmem:[#allocation2 + $0x204] ss:$8 sps:$4 sm:$0xff]   ;;  %v2257_v27 = vld [vmem:[#allocation2 + $0x200] ss:$8 sps:$4 sm:$0xff]  }
  0x3a   :  { %v2262_v28 = vld [vmem:[#allocation2 + $0x2f4] ss:$8 sps:$4 sm:$0xff]   ;;  %v2260_v29 = vld [vmem:[#allocation2 + $0x2f0] ss:$8 sps:$4 sm:$0xff]   ;;  %v986_v46 = vld [vmem:[#allocation5 + $0xf8] sm:$0xff] }
  0x3b   :  { %697 = vmatpush1.bf16.msra.mxu0 %v2182_v30  ;;  %v2265_v30 = vld [vmem:[#allocation2 + $0x2e4] ss:$8 sps:$4 sm:$0xff]   ;;  %v1082_v48 = vunpack.c.h.bf16 %v986_v46  ;;  %v983_v51 = vld [vmem:[#allocation5 + $0xe0] sm:$0xff] }
  0x3c   :  { %738 = vmatpush1.bf16.msra.mxu1 %v2183_v31  ;;  %698 = vmatprep.subr.bf16.mxu0 %v2184_v32  ;;  %v2263_v31 = vld [vmem:[#allocation2 + $0x2e0] ss:$8 sps:$4 sm:$0xff]   ;;  %v2268_v32 = vld [vmem:[#allocation2 + $0x2d4] ss:$8 sps:$4 sm:$0xff]  }
  0x3d   :  { %739 = vmatprep.subr.bf16.mxu1 %v2186_v33  ;;  %v2266_v33 = vld [vmem:[#allocation2 + $0x2d0] ss:$8 sps:$4 sm:$0xff]  }
  0x3f   :  { %699 = vmatpush2.bf16.msra.mxu0 %v2188_v34  ;;  %v2271_v34 = vld [vmem:[#allocation2 + $0x2c4] ss:$8 sps:$4 sm:$0xff]  }
  0x40   :  { %740 = vmatpush2.bf16.msra.mxu1 %v2189_v35  ;;  %700 = vmatprep.subr.bf16.mxu0 %v2190_v36  ;;  %v2269_v35 = vld [vmem:[#allocation2 + $0x2c0] ss:$8 sps:$4 sm:$0xff]   ;;  %v2274_v36 = vld [vmem:[#allocation2 + $0x2b4] ss:$8 sps:$4 sm:$0xff]  }
  0x41   :  { %741 = vmatprep.subr.bf16.mxu1 %v2192_v37  ;;  %v2272_v37 = vld [vmem:[#allocation2 + $0x2b0] ss:$8 sps:$4 sm:$0xff]  }
  0x43   :  { %701 = vmatpush2.bf16.msra.mxu0 %v2194_v38  ;;  %v2277_v38 = vld [vmem:[#allocation2 + $0x2a4] ss:$8 sps:$4 sm:$0xff]  }
  0x44   :  { %742 = vmatpush2.bf16.msra.mxu1 %v2195_v39  ;;  %702 = vmatprep.subr.bf16.mxu0 %v2196_v40  ;;  %v2275_v39 = vld [vmem:[#allocation2 + $0x2a0] ss:$8 sps:$4 sm:$0xff]   ;;  %v2280_v40 = vld [vmem:[#allocation2 + $0x294] ss:$8 sps:$4 sm:$0xff]  }
  0x45   :  { %743 = vmatprep.subr.bf16.mxu1 %v2198_v41  ;;  %v2278_v41 = vld [vmem:[#allocation2 + $0x290] ss:$8 sps:$4 sm:$0xff]  }
  0x47   :  { %703 = vmatpush2.bf16.msra.mxu0 %v2200_v42  ;;  %v2286_v42 = vld [vmem:[#allocation2 + $0x284] ss:$8 sps:$4 sm:$0xff]  }
  0x48   :  { %744 = vmatpush2.bf16.msra.mxu1 %v2201_v43  ;;  %704 = vmatprep.subr.bf16.mxu0 %v2202_v44  ;;  %v2284_v43 = vld [vmem:[#allocation2 + $0x280] ss:$8 sps:$4 sm:$0xff]   ;;  %v1795_v44 = vcombine.low %v2446_v11, %v2446_v11  ;;  %v975_v11 = vld [vmem:[#allocation5 + $0xa0] sm:$0xff] }
  0x49   :  { %745 = vmatprep.subr.bf16.mxu1 %v2204_v45  ;;  %v985_v45 = vld [vmem:[#allocation5 + $0xf0] sm:$0xff] }
  0x4a   :  { %v1080_v47 = vunpack.c.h.bf16 %v985_v45 }
  0x4b   :  { %705 = vmatpush2.bf16.msra.mxu0 %v2206_v49  ;;  %v1079_v49 = vunpack.c.l.bf16 %v985_v45 }
  0x4c   :  { %746 = vmatpush2.bf16.msra.mxu1 %v2207_v50  ;;  %706 = vmatprep.subr.bf16.mxu0 %v2208_v52  ;;  %v1081_v50 = vunpack.c.l.bf16 %v986_v46  ;;  %v984_v52 = vld [vmem:[#allocation5 + $0xe8] sm:$0xff] }
  0x4d   :  { %747 = vmatprep.subr.bf16.mxu1 %v2210_v53  ;;  %v1076_v53 = vunpack.c.h.bf16 %v983_v51 }
  0x4f   :  { %707 = vmatpush2.bf16.msra.mxu0 %v2212_v54  ;;  %v1078_v54 = vunpack.c.h.bf16 %v984_v52 }
  0x50   :  { %748 = vmatpush2.bf16.msra.mxu1 %v2213_v55  ;;  %708 = vmatprep.subr.bf16.mxu0 %v2214_v56  ;;  %v1075_v55 = vunpack.c.l.bf16 %v983_v51  ;;  %v1077_v56 = vunpack.c.l.bf16 %v984_v52 }
  0x51   :  { %749 = vmatprep.subr.bf16.mxu1 %v2216_v57  ;;  %v981_v57 = vld [vmem:[#allocation5 + $0xd0] sm:$0xff] }
  0x53   :  { %709 = vmatpush2.bf16.msra.mxu0 %v2218_v58  ;;  %v982_v58 = vld [vmem:[#allocation5 + $0xd8] sm:$0xff] }
  0x54   :  { %750 = vmatpush2.bf16.msra.mxu1 %v2219_v59  ;;  %710 = vmatprep.subr.bf16.mxu0 %v2220_v60  ;;  %v1072_v59 = vunpack.c.h.bf16 %v981_v57  ;;  %v1074_v60 = vunpack.c.h.bf16 %v982_v58 }
  0x55   :  { %751 = vmatprep.subr.bf16.mxu1 %v2222_v61  ;;  %v1071_v61 = vunpack.c.l.bf16 %v981_v57 }
  0x57   :  { %711 = vmatpush2.bf16.msra.mxu0 %v2224_v62  ;;  %v1073_v62 = vunpack.c.l.bf16 %v982_v58 }
  0x58   :  { %752 = vmatpush2.bf16.msra.mxu1 %v2225_v63  ;;  %712 = vmatprep.subr.bf16.mxu0 %v2226_v0  ;;  %v979_v63 = vld [vmem:[#allocation5 + $0xc0] sm:$0xff]  ;;  %v980_v0 = vld [vmem:[#allocation5 + $0xc8] sm:$0xff] }
  0x59   :  { %753 = vmatprep.subr.bf16.mxu1 %v2228_v1  ;;  %v1068_v1 = vunpack.c.h.bf16 %v979_v63 }
  0x5b   :  { %713 = vmatpush2.bf16.msra.mxu0 %v2230_v2  ;;  %v1070_v2 = vunpack.c.h.bf16 %v980_v0 }
  0x5c   :  { %754 = vmatpush2.bf16.msra.mxu1 %v2231_v3  ;;  %764 = vmatprep.subr.bf16.mxu0 %v2238_v4  ;;  %v1067_v3 = vunpack.c.l.bf16 %v979_v63  ;;  %v1069_v4 = vunpack.c.l.bf16 %v980_v0 }
  0x5d   :  { %819 = vmatprep.subr.bf16.mxu1 %v2283_v9 }
  0x5e   :  { %715 = vmatmul.mubr.bf16.vlgmr.msra.gmra.mxu0 %v1791_v5  ;;  %v977_v5 = vld [vmem:[#allocation5 + $0xb0] sm:$0xff] }
  0x5f   :  { %756 = vmatmul.mubr.bf16.vlgmr.msra.gmra.mxu1 %v1793_v6  ;;  %765 = vmatpush1.bf16.msra.mxu0 %v2236_v7  ;;  %v978_v6 = vld [vmem:[#allocation5 + $0xb8] sm:$0xff]  ;;  %v1064_v7 = vunpack.c.h.bf16 %v977_v5  ;;  %v1063_v9 = vunpack.c.l.bf16 %v977_v5 }
  0x60   :  { %820 = vmatpush1.bf16.msra.mxu1 %v2281_v8  ;;  %766 = vmatprep.subr.bf16.mxu0 %v2241_v10  ;;  %v1066_v8 = vunpack.c.h.bf16 %v978_v6  ;;  %v1065_v10 = vunpack.c.l.bf16 %v978_v6 }
  0x61   :  { %837 = vmatprep.mubr.bf16.mxu1 %v2378_v15  ;;  %796 = vmatprep.mubr.bf16.mxu0 %v1796_v12  ;;  %v976_v12 = vld [vmem:[#allocation5 + $0xa8] sm:$0xff]  ;;  %v1059_v15 = vunpack.c.l.bf16 %v975_v11 }
  0x62   :  { %1147 = vmatprep.subr.mxu1 %v1080_v47  ;;  %v963_v47 = vld [vmem:[#allocation5 + $0x40] sm:$0xff] }
  0x63   :  { %767 = vmatpush1.bf16.msra.mxu0 %v2239_v13  ;;  %v1060_v13 = vunpack.c.h.bf16 %v975_v11  ;;  %v1035_v51 = vunpack.c.l.bf16 %v963_v47 }
  0x64   :  { %768 = vmatprep.subr.bf16.mxu0 %v2244_v14  ;;  %v1062_v14 = vunpack.c.h.bf16 %v976_v12 }
  0x67   :  { %1896 = vmatmul.mubr.msk.bf16.vlgmr.msra.gmra.mxu1 %vm678_vm0, %v2287_v16  ;;  %769 = vmatpush1.bf16.msra.mxu0 %v2242_v17  ;;  %v1061_v16 = vunpack.c.l.bf16 %v976_v12  ;;  %v973_v17 = vld [vmem:[#allocation5 + $0x90] sm:$0xff] }
  0x68   :  { %770 = vmatprep.subr.bf16.mxu0 %v2247_v18  ;;  %1148 = vmatpush1.msra.mxu1 %v1079_v49  ;;  %v974_v18 = vld [vmem:[#allocation5 + $0x98] sm:$0xff]  ;;  %v1036_v49 = vunpack.c.h.bf16 %v963_v47 }
  0x69   :  { %1149 = vmatprep.subr.mxu1 %v1076_v53  ;;  %v961_v53 = vld [vmem:[#allocation5 + $0x30] sm:$0xff] }
  0x6a   :  { %1150 = vmatpush1.msra.mxu1 %v1075_v55  ;;  %v959_v55 = vld [vmem:[#allocation5 + $0x20] sm:$0xff]  ;;  %v1032_v57 = vunpack.c.h.bf16 %v961_v53 }
  0x6b   :  { %771 = vmatpush1.bf16.msra.mxu0 %v2245_v19  ;;  %1151 = vmatprep.subr.mxu1 %v1072_v59  ;;  %v1056_v19 = vunpack.c.h.bf16 %v973_v17  ;;  %v1027_v63 = vunpack.c.l.bf16 %v959_v55  ;;  %v1028_v0 = vunpack.c.h.bf16 %v959_v55 }
  0x6c   :  { %772 = vmatprep.subr.bf16.mxu0 %v2250_v20  ;;  %1152 = vmatpush1.msra.mxu1 %v1071_v61  ;;  %v1058_v20 = vunpack.c.h.bf16 %v974_v18  ;;  %v957_v61 = vld [vmem:[#allocation5 + $0x10] sm:$0xff] }
  0x6d   :  { %1153 = vmatprep.subr.mxu1 %v1068_v1  ;;  %v1024_v5 = vunpack.c.h.bf16 %v957_v61 }
  0x6e   :  { %1154 = vmatpush1.msra.mxu1 %v1067_v3  ;;  %v955_v3 = vld [vmem:[#allocation5] sm:$0xff] }
  0x6f   :  { %773 = vmatpush1.bf16.msra.mxu0 %v2248_v21  ;;  %1155 = vmatprep.subr.mxu1 %v1064_v7  ;;  %v1055_v21 = vunpack.c.l.bf16 %v973_v17  ;;  %v1023_v7 = vunpack.c.l.bf16 %v957_v61  ;;  %v1020_v11 = vunpack.c.h.bf16 %v955_v3 }
  0x70   :  { %774 = vmatprep.subr.bf16.mxu0 %v2253_v22  ;;  %1156 = vmatpush1.msra.mxu1 %v1063_v9  ;;  %v1057_v22 = vunpack.c.l.bf16 %v974_v18  ;;  %v1017_v9 = vld [vmem:[#allocation5 + $0x1f0] sm:$0xff] }
  0x71   :  { %1157 = vmatprep.subr.mxu1 %v1060_v13  ;;  %v1019_v13 = vunpack.c.l.bf16 %v955_v3  ;;  %v1144_v17 = vunpack.c.h.bf16 %v1017_v9 }
  0x72   :  { %1158 = vmatpush1.msra.mxu1 %v1059_v15  ;;  %v1015_v15 = vld [vmem:[#allocation5 + $0x1e0] sm:$0xff] }
  0x73   :  { %775 = vmatpush1.bf16.msra.mxu0 %v2251_v23  ;;  %v971_v23 = vld [vmem:[#allocation5 + $0x80] sm:$0xff]  ;;  %1159 = vmatprep.subr.mxu1 %v1056_v19  ;;  %v1143_v19 = vunpack.c.l.bf16 %v1017_v9 }
  0x74   :  { %776 = vmatprep.subr.bf16.mxu0 %v2256_v24  ;;  %v972_v24 = vld [vmem:[#allocation5 + $0x88] sm:$0xff]  ;;  %1160 = vmatpush1.msra.mxu1 %v1055_v21  ;;  %v1013_v21 = vld [vmem:[#allocation5 + $0x1d0] sm:$0xff] }
  0x77   :  { %777 = vmatpush1.bf16.msra.mxu0 %v2254_v25  ;;  %v1052_v25 = vunpack.c.h.bf16 %v971_v23 }
  0x78   :  { %778 = vmatprep.subr.bf16.mxu0 %v2259_v26  ;;  %v1054_v26 = vunpack.c.h.bf16 %v972_v24 }
  0x79   :  { %1161 = vmatprep.subr.mxu1 %v1052_v25  ;;  %v1139_v25 = vunpack.c.l.bf16 %v1015_v15 }
  0x7b   :  { %779 = vmatpush1.bf16.msra.mxu0 %v2257_v27  ;;  %v1051_v27 = vunpack.c.l.bf16 %v971_v23  ;;  %v1140_v23 = vunpack.c.h.bf16 %v1015_v15 }
  0x7c   :  { %780 = vmatprep.subr.bf16.mxu0 %v2262_v28  ;;  %v1053_v28 = vunpack.c.l.bf16 %v972_v24 }
  0x7d   :  { %1162 = vmatpush1.msra.mxu1 %v1051_v27  ;;  %v1011_v27 = vld [vmem:[#allocation5 + $0x1c0] sm:$0xff] }
  0x7f   :  { %781 = vmatpush2.bf16.msra.mxu0 %v2260_v29  ;;  %v969_v29 = vld [vmem:[#allocation5 + $0x70] sm:$0xff] }
  0x80   :  { %782 = vmatprep.subr.bf16.mxu0 %v2265_v30  ;;  %v970_v30 = vld [vmem:[#allocation5 + $0x78] sm:$0xff] }
  0x83   :  { %783 = vmatpush2.bf16.msra.mxu0 %v2263_v31  ;;  %v1048_v31 = vunpack.c.h.bf16 %v969_v29 }
  0x84   :  { %784 = vmatprep.subr.bf16.mxu0 %v2268_v32  ;;  %v1050_v32 = vunpack.c.h.bf16 %v970_v30 }
  0x85   :  { %1163 = vmatprep.subr.mxu1 %v1048_v31  ;;  %v1135_v31 = vunpack.c.l.bf16 %v1013_v21 }
  0x87   :  { %785 = vmatpush2.bf16.msra.mxu0 %v2266_v33  ;;  %v1047_v33 = vunpack.c.l.bf16 %v969_v29  ;;  %v1136_v29 = vunpack.c.h.bf16 %v1013_v21 }
  0x88   :  { %786 = vmatprep.subr.bf16.mxu0 %v2271_v34  ;;  %v1049_v34 = vunpack.c.l.bf16 %v970_v30 }
  0x89   :  { %1164 = vmatpush1.msra.mxu1 %v1047_v33  ;;  %v1009_v33 = vld [vmem:[#allocation5 + $0x1b0] sm:$0xff] }
  0x8b   :  { %787 = vmatpush2.bf16.msra.mxu0 %v2269_v35  ;;  %v967_v35 = vld [vmem:[#allocation5 + $0x60] sm:$0xff] }
  0x8c   :  { %788 = vmatprep.subr.bf16.mxu0 %v2274_v36  ;;  %v968_v36 = vld [vmem:[#allocation5 + $0x68] sm:$0xff] }
  0x8f   :  { %789 = vmatpush2.bf16.msra.mxu0 %v2272_v37  ;;  %v1044_v37 = vunpack.c.h.bf16 %v967_v35 }
  0x90   :  { %790 = vmatprep.subr.bf16.mxu0 %v2277_v38  ;;  %v1046_v38 = vunpack.c.h.bf16 %v968_v36 }
  0x91   :  { %1165 = vmatprep.subr.mxu1 %v1044_v37  ;;  %v1131_v37 = vunpack.c.l.bf16 %v1011_v27 }
  0x93   :  { %791 = vmatpush2.bf16.msra.mxu0 %v2275_v39  ;;  %v1043_v39 = vunpack.c.l.bf16 %v967_v35  ;;  %v1132_v35 = vunpack.c.h.bf16 %v1011_v27 }
  0x94   :  { %792 = vmatprep.subr.bf16.mxu0 %v2280_v40  ;;  %v1045_v40 = vunpack.c.l.bf16 %v968_v36 }
  0x95   :  { %1166 = vmatpush1.msra.mxu1 %v1043_v39  ;;  %v1007_v39 = vld [vmem:[#allocation5 + $0x1a0] sm:$0xff] }
  0x96   :  { %v1124_v47 = vunpack.c.h.bf16 %v1007_v39 }
  0x97   :  { %793 = vmatpush2.bf16.msra.mxu0 %v2278_v41  ;;  %v965_v41 = vld [vmem:[#allocation5 + $0x50] sm:$0xff] }
  0x98   :  { %794 = vmatprep.subr.bf16.mxu0 %v2286_v42  ;;  %v966_v42 = vld [vmem:[#allocation5 + $0x58] sm:$0xff]  ;;  %v1039_v45 = vunpack.c.l.bf16 %v965_v41 }
  0x99   :  { %v1041_v46 = vunpack.c.l.bf16 %v966_v42 }
  0x9b   :  { %795 = vmatpush2.bf16.msra.mxu0 %v2284_v43  ;;  %v1040_v43 = vunpack.c.h.bf16 %v965_v41  ;;  %v1128_v41 = vunpack.c.h.bf16 %v1009_v33 }
  0x9c   :  { %1218 = vmatprep.subr.mxu0 %v1082_v48  ;;  %v964_v48 = vld [vmem:[#allocation5 + $0x48] sm:$0xff] }
  0x9d   :  { %1167 = vmatprep.subr.mxu1 %v1040_v43  ;;  %v1037_v52 = vunpack.c.l.bf16 %v964_v48  ;;  %v1127_v43 = vunpack.c.l.bf16 %v1009_v33 }
  0x9e   :  { %797 = vmatmul.mubr.bf16.vlgmr.msra.gmra.mxu0 %v1795_v44  ;;  %v1042_v44 = vunpack.c.h.bf16 %v966_v42  ;;  %1168 = vmatpush1.msra.mxu1 %v1039_v45  ;;  %v1005_v45 = vld [vmem:[#allocation5 + $0x190] sm:$0xff] }
  0x9f   :  { %1219 = vmatpush1.msra.mxu0 %v1081_v50  ;;  %v1038_v50 = vunpack.c.h.bf16 %v964_v48  ;;  %1169 = vmatprep.subr.mxu1 %v1036_v49  ;;  %v1123_v49 = vunpack.c.l.bf16 %v1007_v39  ;;  %v1119_v55 = vunpack.c.l.bf16 %v1005_v45 }
  0xa0   :  { %1220 = vmatprep.subr.mxu0 %v1078_v54  ;;  %v962_v54 = vld [vmem:[#allocation5 + $0x38] sm:$0xff]  ;;  %1170 = vmatpush1.msra.mxu1 %v1035_v51  ;;  %v1003_v51 = vld [vmem:[#allocation5 + $0x180] sm:$0xff] }
  0xa1   :  { %1221 = vmatpush1.msra.mxu0 %v1077_v56  ;;  %v1031_v56 = vunpack.c.l.bf16 %v961_v53  ;;  %v1033_v58 = vunpack.c.l.bf16 %v962_v54  ;;  %v1034_v59 = vunpack.c.h.bf16 %v962_v54  ;;  %1171 = vmatprep.subr.mxu1 %v1032_v57  ;;  %v1120_v53 = vunpack.c.h.bf16 %v1005_v45  ;;  %v1001_v57 = vld [vmem:[#allocation5 + $0x170] sm:$0xff] }
  0xa2   :  { %1222 = vmatprep.subr.mxu0 %v1074_v60  ;;  %v960_v60 = vld [vmem:[#allocation5 + $0x28] sm:$0xff]  ;;  %v1115_v61 = vunpack.c.l.bf16 %v1003_v51  ;;  %v1111_v3 = vunpack.c.l.bf16 %v1001_v57 }
  0xa3   :  { %1223 = vmatpush1.msra.mxu0 %v1073_v62  ;;  %v958_v62 = vld [vmem:[#allocation5 + $0x18] sm:$0xff]  ;;  %v1029_v1 = vunpack.c.l.bf16 %v960_v60  ;;  %1172 = vmatpush1.msra.mxu1 %v1031_v56 }
  0xa4   :  { %1224 = vmatprep.subr.mxu0 %v1070_v2  ;;  %v1030_v2 = vunpack.c.h.bf16 %v960_v60  ;;  %v1026_v6 = vunpack.c.h.bf16 %v958_v62  ;;  %1173 = vmatprep.subr.mxu1 %v1028_v0  ;;  %v1000_v0 = vld [vmem:[#allocation5 + $0x168] sm:$0xff] }
  0xa5   :  { %1225 = vmatpush1.msra.mxu0 %v1069_v4  ;;  %v956_v4 = vld [vmem:[#allocation5 + $0x8] sm:$0xff]  ;;  %1174 = vmatpush1.msra.mxu1 %v1027_v63  ;;  %v999_v63 = vld [vmem:[#allocation5 + $0x160] sm:$0xff] }
  0xa6   :  { %1226 = vmatprep.subr.mxu0 %v1066_v8  ;;  %v1025_v8 = vunpack.c.l.bf16 %v958_v62  ;;  %v1022_v12 = vunpack.c.h.bf16 %v956_v4  ;;  %1175 = vmatprep.subr.mxu1 %v1024_v5  ;;  %v997_v5 = vld [vmem:[#allocation5 + $0x150] sm:$0xff]  ;;  %v1107_v9 = vunpack.c.l.bf16 %v999_v63 }
  0xa7   :  { %1227 = vmatpush1.msra.mxu0 %v1065_v10  ;;  %v1018_v10 = vld [vmem:[#allocation5 + $0x1f8] sm:$0xff]  ;;  %1176 = vmatpush1.msra.mxu1 %v1023_v7  ;;  %v1108_v7 = vunpack.c.h.bf16 %v999_v63  ;;  %v1103_v15 = vunpack.c.l.bf16 %v997_v5 }
  0xa8   :  { %1228 = vmatprep.subr.mxu0 %v1062_v14  ;;  %v1021_v14 = vunpack.c.l.bf16 %v956_v4  ;;  %v1146_v18 = vunpack.c.h.bf16 %v1018_v10  ;;  %1177 = vmatprep.subr.mxu1 %v1020_v11  ;;  %v995_v11 = vld [vmem:[#allocation5 + $0x140] sm:$0xff] }
  0xa9   :  { %1229 = vmatpush1.msra.mxu0 %v1061_v16  ;;  %v1016_v16 = vld [vmem:[#allocation5 + $0x1e8] sm:$0xff]  ;;  %1178 = vmatpush1.msra.mxu1 %v1019_v13  ;;  %v1104_v13 = vunpack.c.h.bf16 %v997_v5  ;;  %v1099_v21 = vunpack.c.l.bf16 %v995_v11 }
  0xaa   :  { %1230 = vmatprep.subr.mxu0 %v1058_v20  ;;  %v1145_v20 = vunpack.c.l.bf16 %v1018_v10  ;;  %v1142_v24 = vunpack.c.h.bf16 %v1016_v16  ;;  %1179 = vmatprep.subr.mxu1 %v1144_v17  ;;  %v1109_v10 = vunpack.c.l.bf16 %v1000_v0  ;;  %v993_v17 = vld [vmem:[#allocation5 + $0x130] sm:$0xff] }
  0xab   :  { %1231 = vmatpush1.msra.mxu0 %v1057_v22  ;;  %v1014_v22 = vld [vmem:[#allocation5 + $0x1d8] sm:$0xff]  ;;  %1180 = vmatpush2.msra.mxu1 %v1143_v19  ;;  %v1100_v19 = vunpack.c.h.bf16 %v995_v11  ;;  %v1095_v27 = vunpack.c.l.bf16 %v993_v17 }
  0xac   :  { %1232 = vmatprep.subr.mxu0 %v1054_v26  ;;  %v1141_v26 = vunpack.c.l.bf16 %v1016_v16  ;;  %v1138_v30 = vunpack.c.h.bf16 %v1014_v22  ;;  %1181 = vmatprep.subr.mxu1 %v1140_v23  ;;  %v991_v23 = vld [vmem:[#allocation5 + $0x120] sm:$0xff] }
  0xad   :  { %1233 = vmatpush1.msra.mxu0 %v1053_v28  ;;  %v1012_v28 = vld [vmem:[#allocation5 + $0x1c8] sm:$0xff]  ;;  %1182 = vmatpush2.msra.mxu1 %v1139_v25  ;;  %v1096_v25 = vunpack.c.h.bf16 %v993_v17  ;;  %v1091_v33 = vunpack.c.l.bf16 %v991_v23 }
  0xae   :  { %1234 = vmatprep.subr.mxu0 %v1050_v32  ;;  %v1137_v32 = vunpack.c.l.bf16 %v1014_v22  ;;  %v1134_v36 = vunpack.c.h.bf16 %v1012_v28  ;;  %1183 = vmatprep.subr.mxu1 %v1136_v29  ;;  %v989_v29 = vld [vmem:[#allocation5 + $0x110] sm:$0xff] }
  0xaf   :  { %1235 = vmatpush1.msra.mxu0 %v1049_v34  ;;  %v1010_v34 = vld [vmem:[#allocation5 + $0x1b8] sm:$0xff]  ;;  %1184 = vmatpush2.msra.mxu1 %v1135_v31  ;;  %v1092_v31 = vunpack.c.h.bf16 %v991_v23  ;;  %v1087_v39 = vunpack.c.l.bf16 %v989_v29 }
  0xb0   :  { %1236 = vmatprep.subr.mxu0 %v1046_v38  ;;  %v1133_v38 = vunpack.c.l.bf16 %v1012_v28  ;;  %v1130_v42 = vunpack.c.h.bf16 %v1010_v34  ;;  %1185 = vmatprep.subr.mxu1 %v1132_v35  ;;  %v987_v35 = vld [vmem:[#allocation5 + $0x100] sm:$0xff] }
  0xb1   :  { %1237 = vmatpush1.msra.mxu0 %v1045_v40  ;;  %v1008_v40 = vld [vmem:[#allocation5 + $0x1a8] sm:$0xff]  ;;  %1186 = vmatpush2.msra.mxu1 %v1131_v37  ;;  %v1088_v37 = vunpack.c.h.bf16 %v989_v29 }
  0xb2   :  { %1238 = vmatprep.subr.mxu0 %v1042_v44  ;;  %v1129_v44 = vunpack.c.l.bf16 %v1010_v34  ;;  %v1126_v48 = vunpack.c.h.bf16 %v1008_v40  ;;  %1187 = vmatprep.subr.mxu1 %v1128_v41  ;;  %v1084_v41 = vunpack.c.h.bf16 %v987_v35 }
  0xb3   :  { %1239 = vmatpush1.msra.mxu0 %v1041_v46  ;;  %v1006_v46 = vld [vmem:[#allocation5 + $0x198] sm:$0xff]  ;;  %1188 = vmatpush2.msra.mxu1 %v1127_v43  ;;  %v1083_v43 = vunpack.c.l.bf16 %v987_v35 }
  0xb4   :  { %1240 = vmatprep.subr.mxu0 %v1038_v50  ;;  %v1125_v50 = vunpack.c.l.bf16 %v1008_v40  ;;  %v1122_v54 = vunpack.c.h.bf16 %v1006_v46  ;;  %v1121_v56 = vunpack.c.l.bf16 %v1006_v46  ;;  %1189 = vmatprep.subr.mxu1 %v1124_v47 }
  0xb5   :  { %1241 = vmatpush1.msra.mxu0 %v1037_v52  ;;  %v1004_v52 = vld [vmem:[#allocation5 + $0x188] sm:$0xff]  ;;  %1190 = vmatpush2.msra.mxu1 %v1123_v49 }
  0xb6   :  { %1242 = vmatprep.subr.mxu0 %v1034_v59  ;;  %v1116_v59 = vunpack.c.h.bf16 %v1003_v51  ;;  %v1118_v60 = vunpack.c.h.bf16 %v1004_v52  ;;  %v1117_v62 = vunpack.c.l.bf16 %v1004_v52  ;;  %1191 = vmatprep.subr.mxu1 %v1120_v53 }
  0xb7   :  { %1243 = vmatpush1.msra.mxu0 %v1033_v58  ;;  %v1002_v58 = vld [vmem:[#allocation5 + $0x178] sm:$0xff]  ;;  %1192 = vmatpush2.msra.mxu1 %v1119_v55 }
  0xb8   :  { %1244 = vmatprep.subr.mxu0 %v1030_v2  ;;  %v1114_v2 = vunpack.c.h.bf16 %v1002_v58  ;;  %v1113_v4 = vunpack.c.l.bf16 %v1002_v58  ;;  %1193 = vmatprep.subr.mxu1 %v1116_v59 }
  0xb9   :  { %1245 = vmatpush1.msra.mxu0 %v1029_v1  ;;  %v1112_v1 = vunpack.c.h.bf16 %v1001_v57  ;;  %1194 = vmatpush2.msra.mxu1 %v1115_v61 }
  0xba   :  { %1246 = vmatprep.subr.mxu0 %v1026_v6  ;;  %v998_v6 = vld [vmem:[#allocation5 + $0x158] sm:$0xff] }
  0xbb   :  { %1247 = vmatpush1.msra.mxu0 %v1025_v8  ;;  %v1110_v8 = vunpack.c.h.bf16 %v1000_v0  ;;  %1195 = vmatprep.subr.mxu1 %v1112_v1  ;;  %v1105_v16 = vunpack.c.l.bf16 %v998_v6 }
  0xbc   :  { %1248 = vmatprep.subr.mxu0 %v1022_v12  ;;  %v996_v12 = vld [vmem:[#allocation5 + $0x148] sm:$0xff]  ;;  %1196 = vmatpush2.msra.mxu1 %v1111_v3 }
  0xbd   :  { %1249 = vmatpush1.msra.mxu0 %v1021_v14  ;;  %v1106_v14 = vunpack.c.h.bf16 %v998_v6  ;;  %1197 = vmatprep.subr.mxu1 %v1108_v7  ;;  %v1101_v22 = vunpack.c.l.bf16 %v996_v12 }
  0xbe   :  { %1250 = vmatprep.subr.mxu0 %v1146_v18  ;;  %v994_v18 = vld [vmem:[#allocation5 + $0x138] sm:$0xff]  ;;  %1198 = vmatpush2.msra.mxu1 %v1107_v9 }
  0xbf   :  { %1251 = vmatpush2.msra.mxu0 %v1145_v20  ;;  %v1102_v20 = vunpack.c.h.bf16 %v996_v12  ;;  %1199 = vmatprep.subr.mxu1 %v1104_v13  ;;  %v1097_v28 = vunpack.c.l.bf16 %v994_v18 }
  0xc0   :  { %1252 = vmatprep.subr.mxu0 %v1142_v24  ;;  %v992_v24 = vld [vmem:[#allocation5 + $0x128] sm:$0xff]  ;;  %1200 = vmatpush2.msra.mxu1 %v1103_v15 }
  0xc1   :  { %1253 = vmatpush2.msra.mxu0 %v1141_v26  ;;  %v1098_v26 = vunpack.c.h.bf16 %v994_v18  ;;  %1201 = vmatprep.subr.mxu1 %v1100_v19  ;;  %v1093_v34 = vunpack.c.l.bf16 %v992_v24 }
  0xc2   :  { %1254 = vmatprep.subr.mxu0 %v1138_v30  ;;  %v990_v30 = vld [vmem:[#allocation5 + $0x118] sm:$0xff]  ;;  %1202 = vmatpush2.msra.mxu1 %v1099_v21 }
  0xc3   :  { %1255 = vmatpush2.msra.mxu0 %v1137_v32  ;;  %v1094_v32 = vunpack.c.h.bf16 %v992_v24  ;;  %1203 = vmatprep.subr.mxu1 %v1096_v25  ;;  %v1089_v40 = vunpack.c.l.bf16 %v990_v30 }
  0xc4   :  { %1256 = vmatprep.subr.mxu0 %v1134_v36  ;;  %v988_v36 = vld [vmem:[#allocation5 + $0x108] sm:$0xff]  ;;  %1204 = vmatpush2.msra.mxu1 %v1095_v27 }
  0xc5   :  { %1257 = vmatpush2.msra.mxu0 %v1133_v38  ;;  %v1090_v38 = vunpack.c.h.bf16 %v990_v30  ;;  %1205 = vmatprep.subr.mxu1 %v1092_v31 }
  0xc6   :  { %1258 = vmatprep.subr.mxu0 %v1130_v42  ;;  %v1086_v42 = vunpack.c.h.bf16 %v988_v36  ;;  %1206 = vmatpush2.msra.mxu1 %v1091_v33 }
  0xc7   :  { %1259 = vmatpush2.msra.mxu0 %v1129_v44  ;;  %v1085_v44 = vunpack.c.l.bf16 %v988_v36  ;;  %1207 = vmatprep.subr.mxu1 %v1088_v37 }
  0xc8   :  { %1260 = vmatprep.subr.mxu0 %v1126_v48  ;;  %1208 = vmatpush2.msra.mxu1 %v1087_v39  ;;  %v2379_v39 = vmov 1966171168  }
  0xc9   :  { %1261 = vmatpush2.msra.mxu0 %v1125_v50  ;;  %1209 = vmatprep.subr.mxu1 %v1084_v41  ;;  %v892_v41 = vlaneseq }
  0xca   :  { %1262 = vmatprep.subr.mxu0 %v1122_v54  ;;  %1210 = vmatpush2.msra.mxu1 %v1083_v43 }
  0xcb   :  { %1263 = vmatpush2.msra.mxu0 %v1121_v56  ;;  %v2461_v43 = vshrl.u32 %v892_v41, 7  ;;  %v2034_v41 = vld [vmem:[%s2663_s7 + $0x48] sm:$0xff]  }
  0xcc   :  { %1264 = vmatprep.subr.mxu0 %v1118_v60 }
  0xcd   :  { %1265 = vmatpush2.msra.mxu0 %v1117_v62 }
  0xce   :  { %1266 = vmatprep.subr.mxu0 %v1114_v2 }
  0xcf   :  { %1267 = vmatpush2.msra.mxu0 %v1113_v4 }
  0xd0   :  { %1268 = vmatprep.subr.mxu0 %v1110_v8 }
  0xd1   :  { %1269 = vmatpush2.msra.mxu0 %v1109_v10 }
  0xd2   :  { %1270 = vmatprep.subr.mxu0 %v1106_v14 }
  0xd3   :  { %1271 = vmatpush2.msra.mxu0 %v1105_v16 }
  0xd4   :  { %1272 = vmatprep.subr.mxu0 %v1102_v20 }
  0xd5   :  { %1273 = vmatpush2.msra.mxu0 %v1101_v22 }
  0xd6   :  { %1274 = vmatprep.subr.mxu0 %v1098_v26 }
  0xd7   :  { %1275 = vmatpush2.msra.mxu0 %v1097_v28 }
  0xd8   :  { %1276 = vmatprep.subr.mxu0 %v1094_v32 }
  0xd9   :  { %1277 = vmatpush2.msra.mxu0 %v1093_v34 }
  0xda   :  { %1278 = vmatprep.subr.mxu0 %v1090_v38 }
  0xdb   :  { %1279 = vmatpush2.msra.mxu0 %v1089_v40  ;;  %v890_v40 = vunpack.c.l.s4 %v2379_v39  ;;  %v2027_v39 = vld [vmem:[%s2663_s7 + $0x10] sm:$0xff]  }
  0xdc   :  { %1280 = vmatprep.subr.mxu0 %v1086_v42 }
  0xdd   :  { %1281 = vmatpush2.msra.mxu0 %v1085_v44  ;;  %v891_v42 = vunpack.c.0.s8 %v890_v40 }
 0x11e   :  { %v716_v45 = vpop.f32.mrf.mxu0 }
 0x11f   :  { %v757_v46 = vpop.f32.mrf.mxu1 }
 0x120   :  { %v758_v47 = vadd.f32 %v757_v46, %v716_v45  ;;  %v718_v48 = vpop.f32.mrf.mxu0  ;;  %v2464_v45 = vsub.s32 %v891_v42, %v2461_v43  ;;  %v2026_v42 = vld [vmem:[%s2663_s7 + $0x8] sm:$0xff]  }
 0x121   :  { %v759_v49 = vpop.f32.mrf.mxu1 }
 0x122   :  { %v720_v50 = vpop.f32.mrf.mxu0  ;;  %v760_v59 = vadd.f32 %v759_v49, %v718_v48  ;;  %v881_v49 = vld [vmem:[%s2658_s2] sm:$0x3] }
 0x123   :  { %v761_v51 = vpop.f32.mrf.mxu1 }
 0x124   :  { %v721_v52 = vpop.f32.mrf.mxu0  ;;  %v2472_v51 = vsub.s32 0, %v2461_v43 }
 0x125   :  { %v762_v53 = vpop.f32.mrf.mxu1  ;;  %v2475_v52 = vsub.s32 1, %v2461_v43 }
 0x127   :  { %v839_v54 = vpop.f32.mrf.mxu1 }
 0x129   :  { %v841_v55 = vpop.f32.mrf.mxu1 }
 0x12b   :  { %v843_v56 = vpop.f32.mrf.mxu1 }
 0x12d   :  { %v844_v57 = vpop.f32.mrf.mxu1 }
 0x15e   :  { %v798_v58 = vpop.f32.mrf.mxu0 }
 0x15f   :  { %v799_v60 = vadd.f32 %v798_v58, %v758_v47 }
 0x160   :  { %v800_v61 = vpop.f32.mrf.mxu0 }
 0x161   :  { %v2455_v62 = vadd.f32 %v839_v54, %v799_v60  ;;  %v801_v63 = vadd.f32 %v800_v61, %v760_v59  ;;  %v905_v60 = vld [vmem:[%s2659_s3] sm:$0x3] }
 0x162   :  { %v802_v0 = vpop.f32.mrf.mxu0 }
 0x163   :  { %v846_v1 = vrot.slane %v2455_v62, 4  ;;  %v861_v2 = vmul.f32 %v2455_v62, %v2455_v62  ;;  %v842_v3 = vadd.f32 %v841_v55, %v801_v63 }
 0x164   :  { %v803_v4 = vpop.f32.mrf.mxu0 }
 0x165   :  { %v847_v5 = vadd.f32 %v846_v1, %v2455_v62  ;;  %v863_v6 = vrot.slane %v861_v2, 4  ;;  %v852_v7 = vrot.slane %v842_v3, 4  ;;  %v862_v8 = vmul.f32 %v842_v3, %v842_v3 }
 0x167   :  { %v848_v9 = vrot.slane %v847_v5, 2  ;;  %v864_v10 = vadd.f32 %v863_v6, %v861_v2  ;;  %v853_v11 = vadd.f32 %v852_v7, %v842_v3  ;;  %v869_v12 = vrot.slane %v862_v8, 4 }
 0x169   :  { %v849_v13 = vadd.f32 %v848_v9, %v847_v5  ;;  %v865_v14 = vrot.slane %v864_v10, 2  ;;  %v854_v15 = vrot.slane %v853_v11, 2  ;;  %v870_v16 = vadd.f32 %v869_v12, %v862_v8  ;;  %v2040_v9 = vld [vmem:[%s2663_s7 + $0x78] sm:$0xff]  }
 0x16b   :  { %v850_v17 = vrot.slane %v849_v13, 1  ;;  %v866_v18 = vadd.f32 %v865_v14, %v864_v10  ;;  %v855_v19 = vadd.f32 %v854_v15, %v853_v11  ;;  %v871_v20 = vrot.slane %v870_v16, 2  ;;  %v2031_v15 = vld [vmem:[%s2663_s7 + $0x30] sm:$0xff]  }
 0x16c   :  { %v1961_v10 = vunpack.c.h.bf16 %v2040_v9  ;;  %v1960_v11 = vunpack.c.l.bf16 %v2040_v9 }
 0x16d   :  { %v851_v21 = vadd.f32 %v850_v17, %v849_v13  ;;  %v867_v22 = vrot.slane %v866_v18, 1  ;;  %v856_v23 = vrot.slane %v855_v19, 1  ;;  %v872_v24 = vadd.f32 %v871_v20, %v870_v16  ;;  %v2039_v13 = vld [vmem:[%s2663_s7 + $0x70] sm:$0xff]  }
 0x16e   :  { %2057 = vmatprep.subr.mxu1 %v1961_v10  ;;  %v1957_v14 = vunpack.c.h.bf16 %v2039_v13  ;;  %v1925_v16 = vunpack.c.h.bf16 %v2031_v15  ;;  %v1956_v17 = vunpack.c.l.bf16 %v2039_v13 }
 0x16f   :  { %v859_v25 = vmul.f32 0.125, %v851_v21  ;;  %v868_v26 = vadd.f32 %v867_v22, %v866_v18  ;;  %v873_v27 = vrot.slane %v872_v24, 1  ;;  %v857_v28 = vadd.f32 %v856_v23, %v855_v19  ;;  %v2038_v19 = vld [vmem:[%s2663_s7 + $0x68] sm:$0xff]  }
 0x170   :  { %v1924_v18 = vunpack.c.l.bf16 %v2031_v15  ;;  %v1953_v20 = vunpack.c.h.bf16 %v2038_v19  ;;  %v2030_v21 = vld [vmem:[%s2663_s7 + $0x28] sm:$0xff]   ;;  %v1952_v23 = vunpack.c.l.bf16 %v2038_v19 }
 0x171   :  { %v875_v29 = vmul.f32 0.125, %v868_v26  ;;  %v877_v30 = vmul.f32 %v859_v25, %v859_v25  ;;  %v874_v31 = vadd.f32 %v873_v27, %v872_v24  ;;  %v860_v32 = vmul.f32 0.125, %v857_v28  ;;  %v2029_v27 = vld [vmem:[%s2663_s7 + $0x20] sm:$0xff]  }
 0x172   :  { %v1921_v22 = vunpack.c.h.bf16 %v2030_v21  ;;  %v1920_v24 = vunpack.c.l.bf16 %v2030_v21  ;;  %v1917_v28 = vunpack.c.h.bf16 %v2029_v27 }
 0x173   :  { %v879_v33 = vsub.f32 %v875_v29, %v877_v30  ;;  %v876_v34 = vmul.f32 0.125, %v874_v31  ;;  %v878_v35 = vmul.f32 %v860_v32, %v860_v32  ;;  %v1916_v30 = vunpack.c.l.bf16 %v2029_v27  ;;  %v2036_v31 = vld [vmem:[%s2663_s7 + $0x58] sm:$0xff]  }
 0x175   :  { %v882_v36 = vadd.f32 1e-05, %v879_v33  ;;  %v880_v37 = vsub.f32 %v876_v34, %v878_v35  ;;  %v2028_v33 = vld [vmem:[%s2663_s7 + $0x18] sm:$0xff]   ;;  %v1944_v35 = vunpack.c.l.bf16 %v2036_v31 }
 0x176   :  { %v1913_v34 = vunpack.c.h.bf16 %v2028_v33 }
 0x177   :  { %v883_v38 = vadd.f32 1e-05, %v880_v37  ;;  %2290 = vrsqrt.f32 %v882_v36  ;;  %v1912_v36 = vunpack.c.l.bf16 %v2028_v33  ;;  %v2035_v37 = vld [vmem:[%s2663_s7 + $0x50] sm:$0xff]  }
 0x178   :  { %v1940_v40 = vunpack.c.l.bf16 %v2035_v37 }
 0x179   :  { %2292 = vrsqrt.f32 %v883_v38  ;;  %v1941_v38 = vunpack.c.h.bf16 %v2035_v37 }
 0x184   :  { %v2291_v44 = vpop.eup %2290 }
 0x186   :  { %v2293_v46 = vpop.eup %2292 }
 0x187   :  { %v888_v47 = vcombine.low %v2291_v44, %v2293_v46  ;;  %v1909_v44 = vunpack.c.h.bf16 %v2027_v39  ;;  %v1908_v46 = vunpack.c.l.bf16 %v2027_v39 }
 0x189   :  { %v895_v48 = vrot.slane %v888_v47, %v2464_v45  ;;  %v1937_v47 = vunpack.c.h.bf16 %v2034_v41 }
 0x18b   :  { %v902_v50 = vrot.slane %v895_v48, %v2464_v45  ;;  %v1905_v48 = vunpack.c.h.bf16 %v2026_v42 }
 0x18d   :  { %v904_v53 = vmul.f32 %v902_v50, %v881_v49  ;;  %v2033_v49 = vld [vmem:[%s2663_s7 + $0x40] sm:$0xff]   ;;  %v1936_v50 = vunpack.c.l.bf16 %v2034_v41 }
 0x18f   :  { %v910_v54 = vrot.slane %v904_v53, %v2472_v51  ;;  %v914_v55 = vrot.slane %v904_v53, %v2475_v52  ;;  %v1899_v53 = vld [vmem:[%s2663_s7] sm:$0xff]  }
 0x191   :  { %v917_v56 = vmul.f32 %v910_v54, %v859_v25  ;;  %v918_v57 = vmul.f32 %v914_v55, %v860_v32  ;;  %v939_v0 = vmul.f32 %v914_v55, %v842_v3  ;;  %v938_v2 = vmul.f32 %v910_v54, %v2455_v62  ;;  %v2032_v3 = vld [vmem:[%s2663_s7 + $0x38] sm:$0xff]   ;;  %v2037_v25 = vld [vmem:[%s2663_s7 + $0x60] sm:$0xff]  }
 0x192   :  { %v1929_v62 = vunpack.c.h.bf16 %v2032_v3  ;;  %v1928_v12 = vunpack.c.l.bf16 %v2032_v3  ;;  %v1949_v26 = vunpack.c.h.bf16 %v2037_v25  ;;  %v1948_v29 = vunpack.c.l.bf16 %v2037_v25 }
 0x193   :  { %v921_v58 = vcombine.low %v917_v56, %v918_v57  ;;  %v1945_v32 = vunpack.c.h.bf16 %v2036_v31  ;;  %v1904_v54 = vunpack.c.l.bf16 %v2026_v42  ;;  %v1933_v55 = vunpack.c.h.bf16 %v2033_v49 }
 0x194   :  { %v1901_v56 = vunpack.c.h.bf16 %v1899_v53  ;;  %v1932_v57 = vunpack.c.l.bf16 %v2033_v49 }
 0x195   :  { %v928_v59 = vrot.slane %v921_v58, %v2464_v45  ;;  %v1900_v58 = vunpack.c.l.bf16 %v1899_v53 }
 0x197   :  { %v935_v61 = vrot.slane %v928_v59, %v2464_v45  ;;  %v2538_v59 = vld [vmem:[%s2663_s7 + $0xf8] sm:$0xff]  }
 0x199   :  { %v937_v63 = vsub.f32 %v905_v60, %v935_v61  ;;  %v2025_v60 = vunpack.c.h.bf16 %v2538_v59 }
 0x19b   :  { %v948_v1 = vrot.slane %v937_v63, %v2475_v52  ;;  %v944_v4 = vrot.slane %v937_v63, %v2472_v51 }
 0x19d   :  { %v952_v5 = vadd.f32 %v948_v1, %v939_v0  ;;  %v951_v6 = vadd.f32 %v944_v4, %v938_v2 }
 0x19f   :  { %v954_v7 = vmax.f32 %v952_v5, 0.0  ;;  %v953_v8 = vmax.f32 %v951_v6, 0.0 }
 0x1a1   :  { %1211 = vmatprep.mubr.f32.mxu1 %v954_v7  ;;  %1282 = vmatprep.mubr.f32.mxu0 %v954_v7 }
 0x1a2   :  { %1212 = vmatmul.mubr.f32.vlgmr.msra.gmra.mxu1 %v953_v8  ;;  %1283 = vmatmul.mubr.f32.vlgmr.msra.gmra.mxu0 %v953_v8 }
 0x1a3   :  { %2058 = vmatpush3.msra.mxu1 %v1929_v62 }
 0x1a4   :  { %2059 = vmatprep.subr.mxu1 %v1960_v11 }
 0x1a5   :  { %2060 = vmatpush3.msra.mxu1 %v1928_v12 }
 0x1a6   :  { %2061 = vmatprep.subr.mxu1 %v1957_v14 }
 0x1a7   :  { %2062 = vmatpush3.msra.mxu1 %v1925_v16 }
 0x1a8   :  { %2063 = vmatprep.subr.mxu1 %v1956_v17 }
 0x1a9   :  { %2064 = vmatpush3.msra.mxu1 %v1924_v18 }
 0x1aa   :  { %2065 = vmatprep.subr.mxu1 %v1953_v20 }
 0x1ab   :  { %2066 = vmatpush3.msra.mxu1 %v1921_v22 }
 0x1ac   :  { %2067 = vmatprep.subr.mxu1 %v1952_v23 }
 0x1ad   :  { %2068 = vmatpush3.msra.mxu1 %v1920_v24 }
 0x1ae   :  { %2069 = vmatprep.subr.mxu1 %v1949_v26 }
 0x1af   :  { %2070 = vmatpush3.msra.mxu1 %v1917_v28 }
 0x1b0   :  { %2071 = vmatprep.subr.mxu1 %v1948_v29 }
 0x1b1   :  { %2072 = vmatpush3.msra.mxu1 %v1916_v30 }
 0x1b2   :  { %2073 = vmatprep.subr.mxu1 %v1945_v32 }
 0x1b3   :  { %2074 = vmatpush3.msra.mxu1 %v1913_v34 }
 0x1b4   :  { %2075 = vmatprep.subr.mxu1 %v1944_v35 }
 0x1b5   :  { %2076 = vmatpush3.msra.mxu1 %v1912_v36 }
 0x1b6   :  { %2077 = vmatprep.subr.mxu1 %v1941_v38 }
 0x1b7   :  { %2078 = vmatpush3.msra.mxu1 %v1909_v44 }
 0x1b8   :  { %2079 = vmatprep.subr.mxu1 %v1940_v40 }
 0x1b9   :  { %2080 = vmatpush3.msra.mxu1 %v1908_v46 }
 0x1ba   :  { %2081 = vmatprep.subr.mxu1 %v1937_v47 }
 0x1bb   :  { %2082 = vmatpush3.msra.mxu1 %v1905_v48 }
 0x1bc   :  { %2083 = vmatprep.subr.mxu1 %v1936_v50 }
 0x1bd   :  { %2084 = vmatpush3.msra.mxu1 %v1904_v54 }
 0x1be   :  { %2085 = vmatprep.subr.mxu1 %v1933_v55 }
 0x1bf   :  { %2086 = vmatpush3.msra.mxu1 %v1901_v56 }
 0x1c0   :  { %2087 = vmatprep.subr.mxu1 %v1932_v57 }
 0x1c1   :  { %2088 = vmatpush3.msra.mxu1 %v1900_v58 }
 0x1c2   :  { %2092 = vmatprep.subr.mxu1 %v2025_v60 }
 0x262   :  { %v2541_v61 = vpop.f32.mrf.mxu1  ;;  %v2543_v63 = vpop.f32.mrf.mxu0 }
 0x263   :  { %v1289_v0 = vrot.slane %v2541_v61, 4  ;;  %v1317_v1 = vmul.f32 %v2541_v61, %v2541_v61  ;;  %v1301_v2 = vrot.slane %v2543_v63, 4  ;;  %v1319_v4 = vmul.f32 %v2543_v63, %v2543_v63 }
 0x264   :  { %v2551_v5 = vpop.f32.mrf.mxu1  ;;  %v2553_v6 = vpop.f32.mrf.mxu0 }
 0x265   :  { %v1290_v7 = vadd.f32 %v1289_v0, %v2541_v61  ;;  %v1321_v8 = vrot.slane %v1317_v1, 4  ;;  %v1302_v9 = vadd.f32 %v1301_v2, %v2543_v63  ;;  %v1333_v10 = vrot.slane %v1319_v4, 4 }
 0x266   :  { %v1295_v3 = vrot.slane %v2551_v5, 4  ;;  %v1318_v62 = vmul.f32 %v2551_v5, %v2551_v5  ;;  %v1307_v11 = vrot.slane %v2553_v6, 4  ;;  %v1320_v12 = vmul.f32 %v2553_v6, %v2553_v6 }
 0x267   :  { %v1291_v13 = vrot.slane %v1290_v7, 2  ;;  %v1322_v14 = vadd.f32 %v1321_v8, %v1317_v1  ;;  %v1303_v15 = vrot.slane %v1302_v9, 2  ;;  %v1334_v16 = vadd.f32 %v1333_v10, %v1319_v4 }
 0x268   :  { %v1296_v17 = vadd.f32 %v1295_v3, %v2551_v5  ;;  %v1327_v18 = vrot.slane %v1318_v62, 4  ;;  %v1308_v19 = vadd.f32 %v1307_v11, %v2553_v6  ;;  %v1339_v20 = vrot.slane %v1320_v12, 4 }
 0x269   :  { %v1292_v21 = vadd.f32 %v1291_v13, %v1290_v7  ;;  %v1323_v22 = vrot.slane %v1322_v14, 2  ;;  %v1304_v23 = vadd.f32 %v1303_v15, %v1302_v9  ;;  %v1335_v24 = vrot.slane %v1334_v16, 2 }
 0x26a   :  { %v1297_v25 = vrot.slane %v1296_v17, 2  ;;  %v1328_v26 = vadd.f32 %v1327_v18, %v1318_v62  ;;  %v1309_v27 = vrot.slane %v1308_v19, 2  ;;  %v1340_v28 = vadd.f32 %v1339_v20, %v1320_v12 }
 0x26b   :  { %v1293_v29 = vrot.slane %v1292_v21, 1  ;;  %v1324_v30 = vadd.f32 %v1323_v22, %v1322_v14  ;;  %v1305_v31 = vrot.slane %v1304_v23, 1  ;;  %v1336_v32 = vadd.f32 %v1335_v24, %v1334_v16 }
 0x26c   :  { %v1298_v33 = vadd.f32 %v1297_v25, %v1296_v17  ;;  %v1329_v34 = vrot.slane %v1328_v26, 2  ;;  %v1310_v35 = vadd.f32 %v1309_v27, %v1308_v19  ;;  %v1341_v36 = vrot.slane %v1340_v28, 2  ;;  %v1357_v27 = vld [vmem:[%s2661_s5] sm:$0xf] }
 0x26d   :  { %v1294_v37 = vadd.f32 %v1293_v29, %v1292_v21  ;;  %v1325_v38 = vrot.slane %v1324_v30, 1  ;;  %v1306_v39 = vadd.f32 %v1305_v31, %v1304_v23  ;;  %v1337_v40 = vrot.slane %v1336_v32, 1 }
 0x26e   :  { %v1299_v41 = vrot.slane %v1298_v33, 1  ;;  %v1330_v42 = vadd.f32 %v1329_v34, %v1328_v26  ;;  %v1311_v44 = vrot.slane %v1310_v35, 1  ;;  %v1342_v46 = vadd.f32 %v1341_v36, %v1340_v28 }
 0x26f   :  { %v1313_v47 = vmul.f32 0.125, %v1294_v37  ;;  %v1326_v48 = vadd.f32 %v1325_v38, %v1324_v30  ;;  %v1315_v49 = vmul.f32 0.125, %v1306_v39  ;;  %v1338_v50 = vadd.f32 %v1337_v40, %v1336_v32 }
 0x270   :  { %v1300_v53 = vadd.f32 %v1299_v41, %v1298_v33  ;;  %v1331_v54 = vrot.slane %v1330_v42, 1  ;;  %v1312_v55 = vadd.f32 %v1311_v44, %v1310_v35  ;;  %v1343_v56 = vrot.slane %v1342_v46, 1 }
 0x271   :  { %v1345_v57 = vmul.f32 0.125, %v1326_v48  ;;  %v1349_v58 = vmul.f32 %v1313_v47, %v1313_v47  ;;  %v1347_v60 = vmul.f32 0.125, %v1338_v50  ;;  %v1351_v0 = vmul.f32 %v1315_v49, %v1315_v49  ;;  %v1396_v48 = vld [vmem:[%s2662_s6] sm:$0xf] }
 0x272   :  { %v1314_v1 = vmul.f32 0.125, %v1300_v53  ;;  %v1332_v2 = vadd.f32 %v1331_v54, %v1330_v42  ;;  %v1316_v4 = vmul.f32 0.125, %v1312_v55  ;;  %v1344_v7 = vadd.f32 %v1343_v56, %v1342_v46 }
 0x273   :  { %v1353_v8 = vsub.f32 %v1345_v57, %v1349_v58  ;;  %v1355_v9 = vsub.f32 %v1347_v60, %v1351_v0  ;;  %v1408_v29 = vsub.s32 2, %v2461_v43  ;;  %v1412_v30 = vsub.s32 3, %v2461_v43 }
 0x274   :  { %v1346_v10 = vmul.f32 0.125, %v1332_v2  ;;  %v1350_v3 = vmul.f32 %v1314_v1, %v1314_v1  ;;  %v1348_v62 = vmul.f32 0.125, %v1344_v7  ;;  %v1352_v11 = vmul.f32 %v1316_v4, %v1316_v4 }
 0x275   :  { %v1358_v12 = vadd.f32 1e-05, %v1353_v8  ;;  %v1360_v13 = vadd.f32 1e-05, %v1355_v9  ;;  %v2054_v9 = vld [vmem:[%s2663_s7 + $0xe8] sm:$0xff]  }
 0x276   :  { %v1354_v14 = vsub.f32 %v1346_v10, %v1350_v3  ;;  %v1356_v15 = vsub.f32 %v1348_v62, %v1352_v11  ;;  %v2017_v62 = vunpack.c.h.bf16 %v2054_v9 }
 0x277   :  { %2294 = vrsqrt.f32 %v1358_v12  ;;  %v2053_v12 = vld [vmem:[%s2663_s7 + $0xe0] sm:$0xff]  }
 0x278   :  { %v1359_v16 = vadd.f32 1e-05, %v1354_v14  ;;  %v1361_v17 = vadd.f32 1e-05, %v1356_v15  ;;  %2296 = vrsqrt.f32 %v1360_v13  ;;  %v2016_v13 = vunpack.c.l.bf16 %v2054_v9  ;;  %v2045_v14 = vld [vmem:[%s2663_s7 + $0xa0] sm:$0xff]  }
 0x27a   :  { %2298 = vrsqrt.f32 %v1359_v16  ;;  %v2013_v16 = vunpack.c.h.bf16 %v2053_v12 }
 0x27b   :  { %2300 = vrsqrt.f32 %v1361_v17  ;;  %v1981_v17 = vunpack.c.h.bf16 %v2045_v14 }
 0x284   :  { %v2295_v18 = vpop.eup %2294 }
 0x285   :  { %v2297_v19 = vpop.eup %2296 }
 0x287   :  { %v2299_v20 = vpop.eup %2298 }
 0x288   :  { %v2301_v21 = vpop.eup %2300  ;;  %v1370_v22 = vcombine.low %v2295_v18, %v2299_v20  ;;  %v2052_v18 = vld [vmem:[%s2663_s7 + $0xd8] sm:$0xff]  }
 0x289   :  { %v1371_v23 = vcombine.low %v2297_v19, %v2301_v21  ;;  %v2012_v19 = vunpack.c.l.bf16 %v2053_v12  ;;  %v2044_v20 = vld [vmem:[%s2663_s7 + $0x98] sm:$0xff]   ;;  %v1980_v21 = vunpack.c.l.bf16 %v2045_v14 }
 0x28a   :  { %v1378_v24 = vrot.slane %v1370_v22, %v2464_v45  ;;  %v2009_v22 = vunpack.c.h.bf16 %v2052_v18 }
 0x28b   :  { %v1385_v25 = vrot.slane %v1371_v23, %v2464_v45  ;;  %v1977_v23 = vunpack.c.h.bf16 %v2044_v20 }
 0x28d   :  { %v1386_v26 = vcombine.low %v1378_v24, %v1385_v25  ;;  %v2051_v24 = vld [vmem:[%s2663_s7 + $0xd0] sm:$0xff]   ;;  %v2008_v25 = vunpack.c.l.bf16 %v2052_v18 }
 0x28f   :  { %v1393_v28 = vrot.slane %v1386_v26, %v2464_v45  ;;  %v2043_v26 = vld [vmem:[%s2663_s7 + $0x90] sm:$0xff]  }
 0x291   :  { %v1395_v31 = vmul.f32 %v1393_v28, %v1357_v27  ;;  %v1976_v27 = vunpack.c.l.bf16 %v2044_v20  ;;  %v2005_v28 = vunpack.c.h.bf16 %v2051_v24 }
 0x293   :  { %v2575_v32 = vrot.slane %v1395_v31, %v1408_v29  ;;  %v1413_v33 = vrot.slane %v1395_v31, %v1412_v30  ;;  %v1401_v34 = vrot.slane %v1395_v31, %v2472_v51  ;;  %v1405_v35 = vrot.slane %v1395_v31, %v2475_v52  ;;  %v2050_v31 = vld [vmem:[%s2663_s7 + $0xc8] sm:$0xff]  }
 0x295   :  { %v1420_v36 = vmul.f32 %v2575_v32, %v1315_v49  ;;  %v1421_v37 = vmul.f32 %v1413_v33, %v1316_v4  ;;  %v1418_v38 = vmul.f32 %v1401_v34, %v1313_v47  ;;  %v1419_v39 = vmul.f32 %v1405_v35, %v1314_v1 }
 0x296   :  { %v1455_v49 = vmul.f32 %v1413_v33, %v2553_v6  ;;  %v1453_v47 = vmul.f32 %v1405_v35, %v2551_v5  ;;  %v1452_v55 = vmul.f32 %v1401_v34, %v2541_v61  ;;  %v2024_v61 = vunpack.c.l.bf16 %v2538_v59  ;;  %v2046_v59 = vld [vmem:[%s2663_s7 + $0xa8] sm:$0xff]  }
 0x297   :  { %v1427_v40 = vcombine.low %v1420_v36, %v1421_v37  ;;  %v1426_v41 = vcombine.low %v1418_v38, %v1419_v39  ;;  %v1985_v11 = vunpack.c.h.bf16 %v2046_v59  ;;  %v1984_v15 = vunpack.c.l.bf16 %v2046_v59  ;;  %v2042_v34 = vld [vmem:[%s2663_s7 + $0x88] sm:$0xff]   ;;  %v2049_v38 = vld [vmem:[%s2663_s7 + $0xc0] sm:$0xff]  }
 0x298   :  { %v2004_v33 = vunpack.c.l.bf16 %v2051_v24  ;;  %v1972_v35 = vunpack.c.l.bf16 %v2043_v26  ;;  %v2001_v36 = vunpack.c.h.bf16 %v2050_v31  ;;  %v1969_v37 = vunpack.c.h.bf16 %v2042_v34 }
 0x299   :  { %v1441_v42 = vrot.slane %v1427_v40, %v2464_v45  ;;  %v1434_v44 = vrot.slane %v1426_v41, %v2464_v45  ;;  %v2000_v39 = vunpack.c.l.bf16 %v2050_v31  ;;  %v2041_v40 = vld [vmem:[%s2663_s7 + $0x80] sm:$0xff]  }
 0x29b   :  { %v1442_v46 = vcombine.low %v1434_v44, %v1441_v42  ;;  %v1968_v42 = vunpack.c.l.bf16 %v2042_v34  ;;  %v1997_v44 = vunpack.c.h.bf16 %v2049_v38 }
 0x29d   :  { %v1449_v50 = vrot.slane %v1442_v46, %v2464_v45  ;;  %v2048_v45 = vld [vmem:[%s2663_s7 + $0xb8] sm:$0xff]   ;;  %v1454_v46 = vmul.f32 %v2575_v32, %v2543_v63  ;;  %v1897_v63 = vld [vmem:[%s2664_s8] ss:$0 sm:$0xff]  ;;  %s2380_s8 = smov [#allocation7]  }
 0x29e   :  { %v1993_v5 = vunpack.c.h.bf16 %v2048_v45  ;;  %v1992_v4 = vunpack.c.l.bf16 %v2048_v45  ;;  %s1781_s22 = sshll.u32 %s2380_s8, 4  ;;  %s1782_s22 = int_to_ptr.vmem [resolvable:$true] %s1781_s22 }
 0x29f   :  { %v2586_v53 = vsub.f32 %v1396_v48, %v1449_v50  ;;  %v1965_v48 = vunpack.c.h.bf16 %v2041_v40  ;;  %v1996_v50 = vunpack.c.l.bf16 %v2049_v38  ;;  %s2346_s1 = scalar_lea.vmem %s1782_s22, 128  ;;  %p2351_p11 = scmp.lt.s32.totalorder %s1782_s22, %s1782_s22 }
 0x2a0   :  { %p2347_p10 = scmp.ne.s32.totalorder %s1782_s22, %s2346_s1  ;;  %p2352_p12 = scmp.lt.s32.totalorder %s2346_s1, %s2346_s1 }
 0x2a1   :  { %v1464_v54 = vrot.slane %v2586_v53, %v2475_v52  ;;  %v1460_v56 = vrot.slane %v2586_v53, %v2472_v51  ;;  %v1472_v57 = vrot.slane %v2586_v53, %v1412_v30  ;;  %v2055_v52 = vld [vmem:[%s2663_s7 + $0xf0] sm:$0xff]   ;;  %v1973_v30 = vunpack.c.h.bf16 %v2043_v26 }
 0x2a2   :  { %v2047_v51 = vld [vmem:[%s2663_s7 + $0xb0] sm:$0xff]   ;;  %v2021_v7 = vunpack.c.h.bf16 %v2055_v52  ;;  %v2020_v10 = vunpack.c.l.bf16 %v2055_v52  ;;  %v1468_v41 = vrot.slane %v2586_v53, %v1408_v29  ;;  %p2353_p13 = por %p2352_p12, %p2351_p11 }
 0x2a3   :  { %v1478_v58 = vadd.f32 %v1464_v54, %v1453_v47  ;;  %v1477_v60 = vadd.f32 %v1460_v56, %v1452_v55  ;;  %v1480_v0 = vadd.f32 %v1472_v57, %v1455_v49  ;;  %v1989_v8 = vunpack.c.h.bf16 %v2047_v51 }
 0x2a4   :  { %v1988_v3 = vunpack.c.l.bf16 %v2047_v51  ;;  %v1479_v49 = vadd.f32 %v1468_v41, %v1454_v46  ;;  %v1964_v47 = vunpack.c.l.bf16 %v2041_v40  ;;  %p2354_p0 = pnand %p2353_p13, %p2347_p10 }
 0x2a5   :  { %v1482_v6 = vmax.f32 %v1478_v58, 0.0  ;;  %v1481_v1 = vmax.f32 %v1477_v60, 0.0  ;;  %v1484_v2 = vmax.f32 %v1480_v0, 0.0 }
 0x2a6   :  { %v1483_v43 = vmax.f32 %v1479_v49, 0.0 }
 0x2a7   :  { %1684 = vmatprep.mubr.f32.mxu1 %v1482_v6 }
 0x2a8   :  { %1685 = vmatmul.mubr.f32.vlgmr.msra.gmra.mxu1 %v1481_v1 }
 0x2a9   :  { %2093 = vmatpush3.msra.mxu1 %v1993_v5  ;;  %1754 = vmatprep.mubr.f32.mxu1 %v1484_v2 }
 0x2aa   :  { %2094 = vmatprep.subr.mxu1 %v2024_v61 }
 0x2ab   :  { %2095 = vmatpush3.msra.mxu1 %v1992_v4 }
 0x2ac   :  { %2096 = vmatprep.subr.mxu1 %v2021_v7 }
 0x2ad   :  { %2097 = vmatpush3.msra.mxu1 %v1989_v8 }
 0x2ae   :  { %2098 = vmatprep.subr.mxu1 %v2020_v10 }
 0x2af   :  { %2099 = vmatpush3.msra.mxu1 %v1988_v3 }
 0x2b0   :  { %2100 = vmatprep.subr.mxu1 %v2017_v62 }
 0x2b1   :  { %2101 = vmatpush3.msra.mxu1 %v1985_v11 }
 0x2b2   :  { %2102 = vmatprep.subr.mxu1 %v2016_v13 }
 0x2b3   :  { %2103 = vmatpush3.msra.mxu1 %v1984_v15 }
 0x2b4   :  { %2104 = vmatprep.subr.mxu1 %v2013_v16 }
 0x2b5   :  { %2105 = vmatpush3.msra.mxu1 %v1981_v17 }
 0x2b6   :  { %2106 = vmatprep.subr.mxu1 %v2012_v19 }
 0x2b7   :  { %2107 = vmatpush3.msra.mxu1 %v1980_v21 }
 0x2b8   :  { %2108 = vmatprep.subr.mxu1 %v2009_v22 }
 0x2b9   :  { %2109 = vmatpush3.msra.mxu1 %v1977_v23 }
 0x2ba   :  { %2110 = vmatprep.subr.mxu1 %v2008_v25 }
 0x2bb   :  { %2111 = vmatpush3.msra.mxu1 %v1976_v27 }
 0x2bc   :  { %2112 = vmatprep.subr.mxu1 %v2005_v28 }
 0x2bd   :  { %2113 = vmatpush3.msra.mxu1 %v1973_v30 }
 0x2be   :  { %2114 = vmatprep.subr.mxu1 %v2004_v33 }
 0x2bf   :  { %2115 = vmatpush3.msra.mxu1 %v1972_v35 }
 0x2c0   :  { %2116 = vmatprep.subr.mxu1 %v2001_v36 }
 0x2c1   :  { %2117 = vmatpush3.msra.mxu1 %v1969_v37 }
 0x2c2   :  { %2118 = vmatprep.subr.mxu1 %v2000_v39 }
 0x2c3   :  { %2119 = vmatpush3.msra.mxu1 %v1968_v42 }
 0x2c4   :  { %2120 = vmatprep.subr.mxu1 %v1997_v44 }
 0x2c5   :  { %2121 = vmatpush3.msra.mxu1 %v1965_v48 }
 0x2c6   :  { %2122 = vmatprep.subr.mxu1 %v1996_v50 }
 0x2c7   :  { %2123 = vmatpush3.msra.mxu1 %v1964_v47 }
 0x2c8   :  { %1755 = vmatmul.mubr.f32.vlgmr.msra.gmra.mxu1 %v1483_v43 }
 0x368   :  { %v2089_v29 = vpop.f32.mrf.mxu1 }
 0x36a   :  { %v2090_v53 = vpop.f32.mrf.mxu1 }
 0x36b   :  { %v2091_v54 = vadd.f32 %v2090_v53, %v2089_v29 }
 0x36d   :  { %v1687_v56 = vadd.f32 %v2091_v54, %v1897_v63 }
 0x388   :  { %v2124_v32 = vpop.f32.mrf.mxu1 }
 0x38a   :  { %v2125_v55 = vpop.f32.mrf.mxu1 }
 0x38b   :  { %v2126_v57 = vadd.f32 %v2125_v55, %v2124_v32 }
 0x38d   :  { %v1757_v45 = vadd.f32 %v2126_v57, %v1687_v56 }
 0x38f   :  { %v1761_v58 = vsel %vm1760_vm1, %v1757_v45, -inf }
 0x390   :  { %1762 = vmax.xlane.f32.xlu0 %v1761_v58 }
 0x419   :  { %v1763_v60 = vpop.xlane.xlu0 %1762 }
 0x41a   :  { %v1764_v0 = vsub.f32 %v1757_v45, %v1763_v60 }
 0x41c   :  { %v1765_v6 = vmul.f32 1.442695, %v1764_v0 }
 0x41e   :  { %2302 = vpow2.f32 %v1765_v6 }
 0x42b   :  { %v2303_v1 = vpop.eup %2302 }
 0x42c   :  { %v1767_v5 = vsel %vm1760_vm1, %v2303_v1, 0.0 }
 0x42d   :  { %1768 = vadd.xlane.f32.xlu0 %v1767_v5 }
 0x4b6   :  { %v1769_v52 = vpop.xlane.xlu0 %1768 }
 0x4b7   :  { %2304 = vlog2.f32 %v1769_v52 }
 0x4c4   :  { %v2305_v61 = vpop.eup %2304 }
 0x4c5   :  { %v1771_v51 = vmul.f32 0.6931472, %v2305_v61 }
 0x4c7   :  { %v1772_v2 = vadd.f32 %v1771_v51, %v1763_v60 }
 0x4c9   :  { %v1773_v4 = vsub.f32 %v1757_v45, %v1772_v2 }
 0x4cb   :  { %1774 = vst.msk [vmem:[#allocation7] sm:$0xff] %vm1760_vm1, %v1773_v4 }
 0x4cc   :  { %2357 = shalt.err (!%p2354_p0)
}
 0x4cd   :  { %1784 = dma.vmem_to_hbm [thread:$0]  %s1782_s22, 128, %s2665_s9, [#allocation4]  }
 0x4ce   :  { %2370 = dma.done.wait [#allocation4], 128  }
 0x4cf   :  { %2371 = vsyncadd [#allocation4], 4294967168 }
 0x4d0   :  { %1788 = vsyncpa [#allocation3], 1 }
 0x4d1   :  { %1789 = vsyncpa [#allocation6], 1 }
 0x4d2   :  { %1790 = vsyncpa [#allocation4], 1 }

</bundles_post_ra>
